<compile_context>
chip_gen: v7x
topology: tpu7x:2x2x1
jax: 0.10.0
libtpu: 0.0.40
codegen_flags: <defaults>
</compile_context>

<pallas_src>
import functools

import jax
import jax.numpy as jnp
from jax.experimental import pallas as pl
from jax.experimental.pallas import tpu as pltpu

EPS = 1e-5


def _mlp_kernel(x_ref, w1_ref, w2_ref, w3_ref, vec_ref, out_ref,
                h_ref, s1_ref, q1_ref, s2_ref, q2_ref,
                *, n_valid, tile_n, chunk, num_tiles):
    p = pl.program_id(0)          # 0: L1+stats1, 1: BN1+L2+stats2, 2: BN2+L3
    t = pl.program_id(1)          # batch tile
    inv_n = 1.0 / n_valid
    n_chunks = tile_n // chunk    # static
    base = t * tile_n             # row offset of this tile inside the scratch

    # Packed per-layer vectors (f32 rows): b1, g1, be1, b2, g2, be2, b3.
    b1 = vec_ref[0:1, :]
    g1 = vec_ref[1:2, :]
    be1 = vec_ref[2:3, :]
    b2 = vec_ref[3:4, 0:8]
    g2 = vec_ref[4:5, 0:8]
    be2 = vec_ref[5:6, 0:8]
    b3 = vec_ref[6:7, 0:2]

    last_tile = t == num_tiles - 1

    @pl.when((p == 0) & (t == 0))
    def _init():
        s1_ref[...] = jnp.zeros_like(s1_ref)
        q1_ref[...] = jnp.zeros_like(q1_ref)
        s2_ref[...] = jnp.zeros_like(s2_ref)
        q2_ref[...] = jnp.zeros_like(q2_ref)

    def row_mask(off):
        rows = base + off + jax.lax.broadcasted_iota(jnp.int32, (chunk, 1), 0)
        return rows < n_valid

    # ---------------- pass 0: Linear1 + ReLU, BN1 statistics ----------------
    @pl.when(p == 0)
    def _pass0():
        w1 = w1_ref[...]                                   # (d, 16) bf16

        def tile_loop(masked):
            def body(c, carry):
                off = pl.multiple_of(c * chunk, chunk)
                start = pl.multiple_of(base + off, chunk)
                xb = x_ref[pl.ds(off, chunk), :].astype(jnp.bfloat16)
                a1 = jnp.dot(xb, w1,
                             preferred_element_type=jnp.float32) + b1
                a1 = jnp.maximum(a1, 0.0)
                h_ref[pl.ds(start, chunk), 0:16] = a1
                if masked:                                  # last tile only
                    a1 = jnp.where(row_mask(off), a1, 0.0)
                s1_ref[...] += jnp.sum(a1, axis=0, keepdims=True)
                q1_ref[...] += jnp.sum(a1 * a1, axis=0, keepdims=True)
                return carry
            jax.lax.fori_loop(0, n_chunks, body, 0, unroll=True)

        @pl.when(last_tile)
        def _():
            tile_loop(True)

        @pl.when(t != num_tiles - 1)
        def _():
            tile_loop(False)

    # ------------- pass 1: BN1 + Linear2 + ReLU, BN2 statistics -------------
    @pl.when(p == 1)
    def _pass1():
        mean1 = s1_ref[...] * inv_n
        var1 = q1_ref[...] * inv_n - mean1 * mean1
        scale1 = g1 * jax.lax.rsqrt(var1 + EPS)             # (1,16)
        shift1 = be1 - mean1 * scale1                       # (1,16)
        w2 = w2_ref[...]                                    # (16,8) f32
        # Fold the BN shift into the layer-2 bias:
        #   (h*s + sh) @ W2 + b2 == (h*s) @ W2 + (sh @ W2 + b2)
        b2f = jnp.dot(shift1, w2,
                      preferred_element_type=jnp.float32) + b2   # (1,8)

        def tile_loop(masked):
            def body(c, carry):
                off = pl.multiple_of(c * chunk, chunk)
                start = pl.multiple_of(base + off, chunk)
                h1 = h_ref[pl.ds(start, chunk), 0:16] * scale1
                a2 = jnp.dot(h1, w2,
                             preferred_element_type=jnp.float32) + b2f
                a2 = jnp.maximum(a2, 0.0)
                h_ref[pl.ds(start, chunk), 16:24] = a2
                if masked:
                    a2 = jnp.where(row_mask(off), a2, 0.0)
                s2_ref[...] += jnp.sum(a2, axis=0, keepdims=True)
                q2_ref[...] += jnp.sum(a2 * a2, axis=0, keepdims=True)
                return carry
            jax.lax.fori_loop(0, n_chunks, body, 0, unroll=True)

        @pl.when(last_tile)
        def _():
            tile_loop(True)

        @pl.when(t != num_tiles - 1)
        def _():
            tile_loop(False)

    # --------------------- pass 2: BN2 + Linear3, output --------------------
    @pl.when(p == 2)
    def _pass2():
        mean2 = s2_ref[...] * inv_n
        var2 = q2_ref[...] * inv_n - mean2 * mean2
        scale2 = g2 * jax.lax.rsqrt(var2 + EPS)              # (1,8)
        shift2 = be2 - mean2 * scale2                        # (1,8)
        w3 = w3_ref[...]                                     # (8,2)
        b3f = jnp.dot(shift2, w3,
                      preferred_element_type=jnp.float32) + b3   # (1,2)

        def body(c, carry):
            off = pl.multiple_of(c * chunk, chunk)
            start = pl.multiple_of(base + off, chunk)
            h2 = h_ref[pl.ds(start, chunk), 16:24] * scale2
            out_ref[pl.ds(off, chunk), :] = (
                jnp.dot(h2, w3, preferred_element_type=jnp.float32) + b3f)
            return carry
        jax.lax.fori_loop(0, n_chunks, body, 0, unroll=True)


def _lane_pad(c):
    return ((c + 127) // 128) * 128


def mlp_forward(x, params, *, tile_rows=4096, chunk=128):
    n, d = x.shape

    # Tile sizing: tile is a multiple of the sub-chunk; shrink for tiny batches.
    chunk = max(8, chunk)
    tile_n = min(tile_rows, pl.cdiv(n, chunk) * chunk)
    tile_n = pl.cdiv(tile_n, chunk) * chunk
    num_tiles = pl.cdiv(n, tile_n)
    n_scr = num_tiles * tile_n            # rows in the VMEM activation scratch

    # Weights pre-transposed to (in, out); only W1 pre-cast to bf16 (tiny, used
    # by the bf16 MXU pass). x itself stays f32 in HBM and is cast in-kernel.
    w1t = params["w1"].T.astype(jnp.bfloat16)   # (d, 16)
    w2t = params["w2"].T.astype(jnp.float32)    # (16, 8)
    w3t = params["w3"].T.astype(jnp.float32)    # (8, 2)

    # Pack all small per-layer vectors into one (8, 16) slab -> a single DMA.
    vecs = jnp.zeros((8, 16), jnp.float32)
    vecs = vecs.at[0, :].set(params["b1"])
    vecs = vecs.at[1, :].set(params["g1"])
    vecs = vecs.at[2, :].set(params["be1"])
    vecs = vecs.at[3, :8].set(params["b2"])
    vecs = vecs.at[4, :8].set(params["g2"])
    vecs = vecs.at[5, :8].set(params["be2"])
    vecs = vecs.at[6, :2].set(params["b3"])

    # VMEM budget derived from the actual shapes (lane padding included).
    vmem_needed = (
        n_scr * _lane_pad(32) * 4              # packed h1/h2 scratch
        + 2 * tile_n * _lane_pad(d) * 4        # x double buffer (f32)
        + 2 * tile_n * _lane_pad(2) * 4        # out double buffer
        + (4 << 20)                            # weights, vecs, stats, headroom
    )
    try:
        vmem_phys = int(pltpu.get_tpu_info().vmem_capacity_bytes)
    except Exception:
        vmem_phys = 64 << 20                   # v7x per-core VMEM (worst case)
    vmem_cap = int(vmem_phys * 0.9)
    if vmem_needed > vmem_cap:
        # TODO(synk): HBM-spill path for h1/h2 for very large batches.
        raise ValueError(
            f"batch too large for VMEM-resident activations: "
            f"need {vmem_needed} B > cap {vmem_cap} B")
    vmem_limit = int(min(max(vmem_needed, 16 << 20), vmem_cap))

    kernel = functools.partial(_mlp_kernel, n_valid=n, tile_n=tile_n,
                               chunk=chunk, num_tiles=num_tiles)

    out = pl.pallas_call(
        kernel,
        out_shape=jax.ShapeDtypeStruct((n, 2), jnp.float32),
        grid_spec=pltpu.PrefetchScalarGridSpec(
            num_scalar_prefetch=0,
            grid=(3, num_tiles),
            in_specs=[
                # x streams HBM->VMEM only during pass 0; parked afterwards.
                pl.BlockSpec((tile_n, d),
                             lambda p, t: (jnp.where(p == 0, t, 0), 0)),
                pl.BlockSpec((d, 16), lambda p, t: (0, 0)),
                pl.BlockSpec((16, 8), lambda p, t: (0, 0)),
                pl.BlockSpec((8, 2), lambda p, t: (0, 0)),
                pl.BlockSpec((8, 16), lambda p, t: (0, 0)),
            ],
            # Output tiles are only produced (and written back) during pass 2.
            out_specs=pl.BlockSpec(
                (tile_n, 2), lambda p, t: (jnp.where(p == 2, t, 0), 0)),
            scratch_shapes=[
                pltpu.VMEM((n_scr, 32), jnp.float32),  # h1 lanes 0:16, h2 16:24
                pltpu.VMEM((1, 16), jnp.float32),      # BN1 sum
                pltpu.VMEM((1, 16), jnp.float32),      # BN1 sumsq
                pltpu.VMEM((1, 8), jnp.float32),       # BN2 sum
                pltpu.VMEM((1, 8), jnp.float32),       # BN2 sumsq
            ],
        ),
        compiler_params=pltpu.CompilerParams(
            # BN accumulators serialize passes/tiles -> both "arbitrary".
            dimension_semantics=("arbitrary", "arbitrary"),
            vmem_limit_bytes=vmem_limit,
        ),
    )(x, w1t, w2t, w3t, vecs)
    return out


def init_params(key, input_dim):
    # Mimics MLPModel.initialize(): Linear weights ~ N(0, 1); small biases;
    # BN gamma = 1, beta = 0 (fresh module).
    k1, k2, k3, kb1, kb2, kb3 = jax.random.split(key, 6)
    return {
        "w1": jax.random.normal(k1, (16, input_dim), jnp.float32),
        "b1": 0.01 * jax.random.normal(kb1, (16,), jnp.float32),
        "g1": jnp.ones((16,), jnp.float32),
        "be1": jnp.zeros((16,), jnp.float32),
        "w2": jax.random.normal(k2, (8, 16), jnp.float32),
        "b2": 0.01 * jax.random.normal(kb2, (8,), jnp.float32),
        "g2": jnp.ones((8,), jnp.float32),
        "be2": jnp.zeros((8,), jnp.float32),
        "w3": jax.random.normal(k3, (2, 8), jnp.float32),
        "b3": 0.01 * jax.random.normal(kb3, (2,), jnp.float32),
    }


def reference_forward(x, p):
    # Pure-JAX reference mirroring the kernel math (bf16 x/W1 for the first
    # matmul with f32 accumulation, f32 elsewhere, one-pass BN stats with
    # biased variance, eps=1e-5).
    n = x.shape[0]
    inv_n = 1.0 / n
    a1 = jnp.dot(x.astype(jnp.bfloat16), p["w1"].T.astype(jnp.bfloat16),
                 preferred_element_type=jnp.float32) + p["b1"]
    a1 = jnp.maximum(a1, 0.0)
    m1 = jnp.sum(a1, axis=0, keepdims=True) * inv_n
    v1 = jnp.sum(a1 * a1, axis=0, keepdims=True) * inv_n - m1 * m1
    sc1 = p["g1"] * jax.lax.rsqrt(v1 + EPS)
    h1 = a1 * sc1 + (p["be1"] - m1 * sc1)

    a2 = jnp.dot(h1, p["w2"].T, preferred_element_type=jnp.float32) + p["b2"]
    a2 = jnp.maximum(a2, 0.0)
    m2 = jnp.sum(a2, axis=0, keepdims=True) * inv_n
    v2 = jnp.sum(a2 * a2, axis=0, keepdims=True) * inv_n - m2 * m2
    sc2 = p["g2"] * jax.lax.rsqrt(v2 + EPS)
    h2 = a2 * sc2 + (p["be2"] - m2 * sc2)

    return jnp.dot(h2, p["w3"].T, preferred_element_type=jnp.float32) + p["b3"]


if __name__ == "__main__":
    key = jax.random.PRNGKey(0)
    kx, kp = jax.random.split(key)

    # Batch deliberately NOT a multiple of the chunk/tile to exercise the
    # ragged-tail masking and partial-block writeback.
    batch, input_dim = 200, 32
    x = jax.random.normal(kx, (batch, input_dim), jnp.float32)
    params = init_params(kp, input_dim)

    out = jax.block_until_ready(mlp_forward(x, params))
    ref = reference_forward(x, params)

    assert out.shape == (batch, 2)
    err = float(jnp.max(jnp.abs(out - ref)))
    assert jnp.allclose(out, ref, atol=2e-3, rtol=2e-3), f"max abs diff {err}"
    print("KERNEL_OK")
</pallas_src>

<mosaic_0001>
module attributes {stable_mosaic.version = 11 : i64} {
  func.func @_mlp_kernel(%arg0: i32, %arg1: i32, %arg2: memref<256x32xf32, #tpu.memory_space<vmem>>, %arg3: memref<32x16xbf16, #tpu.memory_space<vmem>>, %arg4: memref<16x8xf32, #tpu.memory_space<vmem>>, %arg5: memref<8x2xf32, #tpu.memory_space<vmem>>, %arg6: memref<8x16xf32, #tpu.memory_space<vmem>>, %arg7: memref<256x2xf32, #tpu.memory_space<vmem>>, %arg8: memref<256x32xf32, #tpu.memory_space<vmem>>, %arg9: memref<1x16xf32, #tpu.memory_space<vmem>>, %arg10: memref<1x16xf32, #tpu.memory_space<vmem>>, %arg11: memref<1x8xf32, #tpu.memory_space<vmem>>, %arg12: memref<1x8xf32, #tpu.memory_space<vmem>>) attributes {dimension_semantics = [#tpu.dimension_semantics<arbitrary>, #tpu.dimension_semantics<arbitrary>], iteration_bounds = array<i64: 3, 1>, scalar_prefetch = 0 : i64, scratch_operands = 5 : i64, tpu.core_type = #tpu.core_type<tc>, window_params = [{transform_indices = @transform_0, window_bounds = array<i64: 256, 32>}, {pipeline_mode = #tpu.pipeline_mode<synchronous>, transform_indices = @transform_1, window_bounds = array<i64: 32, 16>}, {pipeline_mode = #tpu.pipeline_mode<synchronous>, transform_indices = @transform_2, window_bounds = array<i64: 16, 8>}, {pipeline_mode = #tpu.pipeline_mode<synchronous>, transform_indices = @transform_3, window_bounds = array<i64: 8, 2>}, {pipeline_mode = #tpu.pipeline_mode<synchronous>, transform_indices = @transform_4, window_bounds = array<i64: 8, 16>}, {transform_indices = @transform_5, window_bounds = array<i64: 256, 2>}]} {
    %c256_i32 = arith.constant 256 : i32
    %0 = arith.muli %arg1, %c256_i32 : i32
    %c0 = arith.constant 0 : index
    %c0_0 = arith.constant 0 : index
    %1 = vector.load %arg6[%c0, %c0_0] : memref<8x16xf32, #tpu.memory_space<vmem>>, vector<1x16xf32>
    %c1 = arith.constant 1 : index
    %c0_1 = arith.constant 0 : index
    %2 = vector.load %arg6[%c1, %c0_1] : memref<8x16xf32, #tpu.memory_space<vmem>>, vector<1x16xf32>
    %c2 = arith.constant 2 : index
    %c0_2 = arith.constant 0 : index
    %3 = vector.load %arg6[%c2, %c0_2] : memref<8x16xf32, #tpu.memory_space<vmem>>, vector<1x16xf32>
    %c3 = arith.constant 3 : index
    %c0_3 = arith.constant 0 : index
    %4 = vector.load %arg6[%c3, %c0_3] : memref<8x16xf32, #tpu.memory_space<vmem>>, vector<1x8xf32>
    %c4 = arith.constant 4 : index
    %c0_4 = arith.constant 0 : index
    %5 = vector.load %arg6[%c4, %c0_4] : memref<8x16xf32, #tpu.memory_space<vmem>>, vector<1x8xf32>
    %c5 = arith.constant 5 : index
    %c0_5 = arith.constant 0 : index
    %6 = vector.load %arg6[%c5, %c0_5] : memref<8x16xf32, #tpu.memory_space<vmem>>, vector<1x8xf32>
    %c6 = arith.constant 6 : index
    %c0_6 = arith.constant 0 : index
    %7 = vector.load %arg6[%c6, %c0_6] : memref<8x16xf32, #tpu.memory_space<vmem>>, vector<1x2xf32>
    %c0_i32 = arith.constant 0 : i32
    %8 = arith.cmpi eq, %arg1, %c0_i32 : i32
    %c0_i32_7 = arith.constant 0 : i32
    %9 = arith.cmpi eq, %arg0, %c0_i32_7 : i32
    %c0_i32_8 = arith.constant 0 : i32
    %10 = arith.cmpi eq, %arg1, %c0_i32_8 : i32
    %11 = arith.andi %9, %10 : i1
    %12 = arith.extui %11 : i1 to i32
    %c0_i32_9 = arith.constant 0 : i32
    %13 = arith.cmpi ne, %12, %c0_i32_9 : i32
    scf.if %13 {
      %cst = arith.constant 0.000000e+00 : f32
      %23 = vector.broadcast %cst : f32 to vector<1x16xf32>
      %c0_14 = arith.constant 0 : index
      %c0_15 = arith.constant 0 : index
      %24 = vector.load %arg9[%c0_14, %c0_15] : memref<1x16xf32, #tpu.memory_space<vmem>>, vector<1x16xf32>
      tpu.vector_store %arg9[%c0_14, %c0_15], %23 {strides = array<i32>} : memref<1x16xf32, #tpu.memory_space<vmem>>, vector<1x16xf32>,
      %cst_16 = arith.constant 0.000000e+00 : f32
      %25 = vector.broadcast %cst_16 : f32 to vector<1x16xf32>
      %c0_17 = arith.constant 0 : index
      %c0_18 = arith.constant 0 : index
      %26 = vector.load %arg10[%c0_17, %c0_18] : memref<1x16xf32, #tpu.memory_space<vmem>>, vector<1x16xf32>
      tpu.vector_store %arg10[%c0_17, %c0_18], %25 {strides = array<i32>} : memref<1x16xf32, #tpu.memory_space<vmem>>, vector<1x16xf32>,
      %cst_19 = arith.constant 0.000000e+00 : f32
      %27 = vector.broadcast %cst_19 : f32 to vector<1x8xf32>
      %c0_20 = arith.constant 0 : index
      %c0_21 = arith.constant 0 : index
      %28 = vector.load %arg11[%c0_20, %c0_21] : memref<1x8xf32, #tpu.memory_space<vmem>>, vector<1x8xf32>
      tpu.vector_store %arg11[%c0_20, %c0_21], %27 {strides = array<i32>} : memref<1x8xf32, #tpu.memory_space<vmem>>, vector<1x8xf32>,
      %cst_22 = arith.constant 0.000000e+00 : f32
      %29 = vector.broadcast %cst_22 : f32 to vector<1x8xf32>
      %c0_23 = arith.constant 0 : index
      %c0_24 = arith.constant 0 : index
      %30 = vector.load %arg12[%c0_23, %c0_24] : memref<1x8xf32, #tpu.memory_space<vmem>>, vector<1x8xf32>
      tpu.vector_store %arg12[%c0_23, %c0_24], %29 {strides = array<i32>} : memref<1x8xf32, #tpu.memory_space<vmem>>, vector<1x8xf32>,
    } else {
    }
    %c0_i32_10 = arith.constant 0 : i32
    %14 = arith.cmpi eq, %arg0, %c0_i32_10 : i32
    %15 = arith.extui %14 : i1 to i32
    %c0_i32_11 = arith.constant 0 : i32
    %16 = arith.cmpi ne, %15, %c0_i32_11 : i32
    scf.if %16 {
      %c0_14 = arith.constant 0 : index
      %c0_15 = arith.constant 0 : index
      %23 = vector.load %arg3[%c0_14, %c0_15] : memref<32x16xbf16, #tpu.memory_space<vmem>>, vector<32x16xbf16>
      %24 = arith.extui %8 : i1 to i32
      %c0_i32_16 = arith.constant 0 : i32
      %25 = arith.cmpi ne, %24, %c0_i32_16 : i32
      scf.if %25 {
        %c0_i32_19 = arith.constant 0 : i32
        %c128_i32 = arith.constant 128 : i32
        %29 = arith.muli %c0_i32_19, %c128_i32 : i32
        %30 = tpu.assume_multiple %29, 128 : i32
        %31 = arith.addi %0, %30 : i32
        %32 = tpu.assume_multiple %31, 128 : i32
        %33 = arith.index_cast %30 : i32 to index
        %c0_20 = arith.constant 0 : index
        %34 = vector.load %arg2[%33, %c0_20] : memref<256x32xf32, #tpu.memory_space<vmem>>, vector<128x32xf32>
        %35 = arith.truncf %34 : vector<128x32xf32> to vector<128x32xbf16>
        %cst = arith.constant dense<0.000000e+00> : vector<128x16xf32>
        %36 = tpu.matmul %35, %23, %cst {dimension_numbers = #tpu.dot_dimension_numbers<[1], [0], [0], [1], [0, 0, 1, 1], [], []>} : vector<128x32xbf16>, vector<32x16xbf16>, vector<128x16xf32> -> vector<128x16xf32>
        %37 = vector.broadcast %1 : vector<1x16xf32> to vector<128x16xf32>
        %38 = arith.addf %36, %37 : vector<128x16xf32>
        %cst_21 = arith.constant 0.000000e+00 : f32
        %39 = vector.broadcast %cst_21 : f32 to vector<128x16xf32>
        %40 = arith.maximumf %38, %39 : vector<128x16xf32>
        %41 = arith.index_cast %32 : i32 to index
        %c0_22 = arith.constant 0 : index
        %42 = vector.load %arg8[%41, %c0_22] : memref<256x32xf32, #tpu.memory_space<vmem>>, vector<128x16xf32>
        tpu.vector_store %arg8[%41, %c0_22], %40 {strides = array<i32>} : memref<256x32xf32, #tpu.memory_space<vmem>>, vector<128x16xf32>,
        %43 = arith.addi %0, %30 : i32
        %44 = tpu.iota {dimensions = array<i32: 0>} : vector<128x1xi32>
        %45 = vector.broadcast %43 : i32 to vector<128x1xi32>
        %46 = arith.addi %45, %44 : vector<128x1xi32>
        %c200_i32 = arith.constant 200 : i32
        %47 = vector.broadcast %c200_i32 : i32 to vector<128x1xi32>
        %48 = arith.cmpi slt, %46, %47 : vector<128x1xi32>
        %cst_23 = arith.constant 0.000000e+00 : f32
        %49 = vector.shape_cast %48 : vector<128x1xi1> to vector<128x1xi1>
        %50 = vector.broadcast %49 : vector<128x1xi1> to vector<128x16xi1>
        %51 = vector.broadcast %cst_23 : f32 to vector<128x16xf32>
        %52 = arith.select %50, %40, %51 : vector<128x16xi1>, vector<128x16xf32>
        %c0_24 = arith.constant 0 : index
        %c0_25 = arith.constant 0 : index
        %53 = vector.load %arg9[%c0_24, %c0_25] : memref<1x16xf32, #tpu.memory_space<vmem>>, vector<1x16xf32>
        %cst_26 = arith.constant dense<0.000000e+00> : vector<16xf32>
        %54 = vector.multi_reduction <add>, %52, %cst_26 [0] : vector<128x16xf32> to vector<16xf32>
        %55 = vector.shape_cast %54 : vector<16xf32> to vector<1x16xf32>
        %56 = arith.addf %53, %55 : vector<1x16xf32>
        %c0_27 = arith.constant 0 : index
        %c0_28 = arith.constant 0 : index
        %57 = vector.load %arg9[%c0_27, %c0_28] : memref<1x16xf32, #tpu.memory_space<vmem>>, vector<1x16xf32>
        tpu.vector_store %arg9[%c0_27, %c0_28], %56 {strides = array<i32>} : memref<1x16xf32, #tpu.memory_space<vmem>>, vector<1x16xf32>,
        %c0_29 = arith.constant 0 : index
        %c0_30 = arith.constant 0 : index
        %58 = vector.load %arg10[%c0_29, %c0_30] : memref<1x16xf32, #tpu.memory_space<vmem>>, vector<1x16xf32>
        %59 = arith.mulf %52, %52 : vector<128x16xf32>
        %cst_31 = arith.constant dense<0.000000e+00> : vector<16xf32>
        %60 = vector.multi_reduction <add>, %59, %cst_31 [0] : vector<128x16xf32> to vector<16xf32>
        %61 = vector.shape_cast %60 : vector<16xf32> to vector<1x16xf32>
        %62 = arith.addf %58, %61 : vector<1x16xf32>
        %c0_32 = arith.constant 0 : index
        %c0_33 = arith.constant 0 : index
        %63 = vector.load %arg10[%c0_32, %c0_33] : memref<1x16xf32, #tpu.memory_space<vmem>>, vector<1x16xf32>
        tpu.vector_store %arg10[%c0_32, %c0_33], %62 {strides = array<i32>} : memref<1x16xf32, #tpu.memory_space<vmem>>, vector<1x16xf32>,
        %c1_i32_34 = arith.constant 1 : i32
        %c128_i32_35 = arith.constant 128 : i32
        %64 = arith.muli %c1_i32_34, %c128_i32_35 : i32
        %65 = tpu.assume_multiple %64, 128 : i32
        %66 = arith.addi %0, %65 : i32
        %67 = tpu.assume_multiple %66, 128 : i32
        %68 = arith.index_cast %65 : i32 to index
        %c0_36 = arith.constant 0 : index
        %69 = vector.load %arg2[%68, %c0_36] : memref<256x32xf32, #tpu.memory_space<vmem>>, vector<128x32xf32>
        %70 = arith.truncf %69 : vector<128x32xf32> to vector<128x32xbf16>
        %cst_37 = arith.constant dense<0.000000e+00> : vector<128x16xf32>
        %71 = tpu.matmul %70, %23, %cst_37 {dimension_numbers = #tpu.dot_dimension_numbers<[1], [0], [0], [1], [0, 0, 1, 1], [], []>} : vector<128x32xbf16>, vector<32x16xbf16>, vector<128x16xf32> -> vector<128x16xf32>
        %72 = vector.broadcast %1 : vector<1x16xf32> to vector<128x16xf32>
        %73 = arith.addf %71, %72 : vector<128x16xf32>
        %cst_38 = arith.constant 0.000000e+00 : f32
        %74 = vector.broadcast %cst_38 : f32 to vector<128x16xf32>
        %75 = arith.maximumf %73, %74 : vector<128x16xf32>
        %76 = arith.index_cast %67 : i32 to index
        %c0_39 = arith.constant 0 : index
        %77 = vector.load %arg8[%76, %c0_39] : memref<256x32xf32, #tpu.memory_space<vmem>>, vector<128x16xf32>
        tpu.vector_store %arg8[%76, %c0_39], %75 {strides = array<i32>} : memref<256x32xf32, #tpu.memory_space<vmem>>, vector<128x16xf32>,
        %78 = arith.addi %0, %65 : i32
        %79 = tpu.iota {dimensions = array<i32: 0>} : vector<128x1xi32>
        %80 = vector.broadcast %78 : i32 to vector<128x1xi32>
        %81 = arith.addi %80, %79 : vector<128x1xi32>
        %c200_i32_40 = arith.constant 200 : i32
        %82 = vector.broadcast %c200_i32_40 : i32 to vector<128x1xi32>
        %83 = arith.cmpi slt, %81, %82 : vector<128x1xi32>
        %cst_41 = arith.constant 0.000000e+00 : f32
        %84 = vector.shape_cast %83 : vector<128x1xi1> to vector<128x1xi1>
        %85 = vector.broadcast %84 : vector<128x1xi1> to vector<128x16xi1>
        %86 = vector.broadcast %cst_41 : f32 to vector<128x16xf32>
        %87 = arith.select %85, %75, %86 : vector<128x16xi1>, vector<128x16xf32>
        %c0_42 = arith.constant 0 : index
        %c0_43 = arith.constant 0 : index
        %88 = vector.load %arg9[%c0_42, %c0_43] : memref<1x16xf32, #tpu.memory_space<vmem>>, vector<1x16xf32>
        %cst_44 = arith.constant dense<0.000000e+00> : vector<16xf32>
        %89 = vector.multi_reduction <add>, %87, %cst_44 [0] : vector<128x16xf32> to vector<16xf32>
        %90 = vector.shape_cast %89 : vector<16xf32> to vector<1x16xf32>
        %91 = arith.addf %88, %90 : vector<1x16xf32>
        %c0_45 = arith.constant 0 : index
        %c0_46 = arith.constant 0 : index
        %92 = vector.load %arg9[%c0_45, %c0_46] : memref<1x16xf32, #tpu.memory_space<vmem>>, vector<1x16xf32>
        tpu.vector_store %arg9[%c0_45, %c0_46], %91 {strides = array<i32>} : memref<1x16xf32, #tpu.memory_space<vmem>>, vector<1x16xf32>,
        %c0_47 = arith.constant 0 : index
        %c0_48 = arith.constant 0 : index
        %93 = vector.load %arg10[%c0_47, %c0_48] : memref<1x16xf32, #tpu.memory_space<vmem>>, vector<1x16xf32>
        %94 = arith.mulf %87, %87 : vector<128x16xf32>
        %cst_49 = arith.constant dense<0.000000e+00> : vector<16xf32>
        %95 = vector.multi_reduction <add>, %94, %cst_49 [0] : vector<128x16xf32> to vector<16xf32>
        %96 = vector.shape_cast %95 : vector<16xf32> to vector<1x16xf32>
        %97 = arith.addf %93, %96 : vector<1x16xf32>
        %c0_50 = arith.constant 0 : index
        %c0_51 = arith.constant 0 : index
        %98 = vector.load %arg10[%c0_50, %c0_51] : memref<1x16xf32, #tpu.memory_space<vmem>>, vector<1x16xf32>
        tpu.vector_store %arg10[%c0_50, %c0_51], %97 {strides = array<i32>} : memref<1x16xf32, #tpu.memory_space<vmem>>, vector<1x16xf32>,
        %c2_i32_52 = arith.constant 2 : i32
      } else {
      }
      %c0_i32_17 = arith.constant 0 : i32
      %26 = arith.cmpi ne, %arg1, %c0_i32_17 : i32
      %27 = arith.extui %26 : i1 to i32
      %c0_i32_18 = arith.constant 0 : i32
      %28 = arith.cmpi ne, %27, %c0_i32_18 : i32
      scf.if %28 {
        %c0_i32_19 = arith.constant 0 : i32
        %c128_i32 = arith.constant 128 : i32
        %29 = arith.muli %c0_i32_19, %c128_i32 : i32
        %30 = tpu.assume_multiple %29, 128 : i32
        %31 = arith.addi %0, %30 : i32
        %32 = tpu.assume_multiple %31, 128 : i32
        %33 = arith.index_cast %30 : i32 to index
        %c0_20 = arith.constant 0 : index
        %34 = vector.load %arg2[%33, %c0_20] : memref<256x32xf32, #tpu.memory_space<vmem>>, vector<128x32xf32>
        %35 = arith.truncf %34 : vector<128x32xf32> to vector<128x32xbf16>
        %cst = arith.constant dense<0.000000e+00> : vector<128x16xf32>
        %36 = tpu.matmul %35, %23, %cst {dimension_numbers = #tpu.dot_dimension_numbers<[1], [0], [0], [1], [0, 0, 1, 1], [], []>} : vector<128x32xbf16>, vector<32x16xbf16>, vector<128x16xf32> -> vector<128x16xf32>
        %37 = vector.broadcast %1 : vector<1x16xf32> to vector<128x16xf32>
        %38 = arith.addf %36, %37 : vector<128x16xf32>
        %cst_21 = arith.constant 0.000000e+00 : f32
        %39 = vector.broadcast %cst_21 : f32 to vector<128x16xf32>
        %40 = arith.maximumf %38, %39 : vector<128x16xf32>
        %41 = arith.index_cast %32 : i32 to index
        %c0_22 = arith.constant 0 : index
        %42 = vector.load %arg8[%41, %c0_22] : memref<256x32xf32, #tpu.memory_space<vmem>>, vector<128x16xf32>
        tpu.vector_store %arg8[%41, %c0_22], %40 {strides = array<i32>} : memref<256x32xf32, #tpu.memory_space<vmem>>, vector<128x16xf32>,
        %c0_23 = arith.constant 0 : index
        %c0_24 = arith.constant 0 : index
        %43 = vector.load %arg9[%c0_23, %c0_24] : memref<1x16xf32, #tpu.memory_space<vmem>>, vector<1x16xf32>
        %cst_25 = arith.constant dense<0.000000e+00> : vector<16xf32>
        %44 = vector.multi_reduction <add>, %40, %cst_25 [0] : vector<128x16xf32> to vector<16xf32>
        %45 = vector.shape_cast %44 : vector<16xf32> to vector<1x16xf32>
        %46 = arith.addf %43, %45 : vector<1x16xf32>
        %c0_26 = arith.constant 0 : index
        %c0_27 = arith.constant 0 : index
        %47 = vector.load %arg9[%c0_26, %c0_27] : memref<1x16xf32, #tpu.memory_space<vmem>>, vector<1x16xf32>
        tpu.vector_store %arg9[%c0_26, %c0_27], %46 {strides = array<i32>} : memref<1x16xf32, #tpu.memory_space<vmem>>, vector<1x16xf32>,
        %c0_28 = arith.constant 0 : index
        %c0_29 = arith.constant 0 : index
        %48 = vector.load %arg10[%c0_28, %c0_29] : memref<1x16xf32, #tpu.memory_space<vmem>>, vector<1x16xf32>
        %49 = arith.mulf %40, %40 : vector<128x16xf32>
        %cst_30 = arith.constant dense<0.000000e+00> : vector<16xf32>
        %50 = vector.multi_reduction <add>, %49, %cst_30 [0] : vector<128x16xf32> to vector<16xf32>
        %51 = vector.shape_cast %50 : vector<16xf32> to vector<1x16xf32>
        %52 = arith.addf %48, %51 : vector<1x16xf32>
        %c0_31 = arith.constant 0 : index
        %c0_32 = arith.constant 0 : index
        %53 = vector.load %arg10[%c0_31, %c0_32] : memref<1x16xf32, #tpu.memory_space<vmem>>, vector<1x16xf32>
        tpu.vector_store %arg10[%c0_31, %c0_32], %52 {strides = array<i32>} : memref<1x16xf32, #tpu.memory_space<vmem>>, vector<1x16xf32>,
        %c1_i32_33 = arith.constant 1 : i32
        %c128_i32_34 = arith.constant 128 : i32
        %54 = arith.muli %c1_i32_33, %c128_i32_34 : i32
        %55 = tpu.assume_multiple %54, 128 : i32
        %56 = arith.addi %0, %55 : i32
        %57 = tpu.assume_multiple %56, 128 : i32
        %58 = arith.index_cast %55 : i32 to index
        %c0_35 = arith.constant 0 : index
        %59 = vector.load %arg2[%58, %c0_35] : memref<256x32xf32, #tpu.memory_space<vmem>>, vector<128x32xf32>
        %60 = arith.truncf %59 : vector<128x32xf32> to vector<128x32xbf16>
        %cst_36 = arith.constant dense<0.000000e+00> : vector<128x16xf32>
        %61 = tpu.matmul %60, %23, %cst_36 {dimension_numbers = #tpu.dot_dimension_numbers<[1], [0], [0], [1], [0, 0, 1, 1], [], []>} : vector<128x32xbf16>, vector<32x16xbf16>, vector<128x16xf32> -> vector<128x16xf32>
        %62 = vector.broadcast %1 : vector<1x16xf32> to vector<128x16xf32>
        %63 = arith.addf %61, %62 : vector<128x16xf32>
        %cst_37 = arith.constant 0.000000e+00 : f32
        %64 = vector.broadcast %cst_37 : f32 to vector<128x16xf32>
        %65 = arith.maximumf %63, %64 : vector<128x16xf32>
        %66 = arith.index_cast %57 : i32 to index
        %c0_38 = arith.constant 0 : index
        %67 = vector.load %arg8[%66, %c0_38] : memref<256x32xf32, #tpu.memory_space<vmem>>, vector<128x16xf32>
        tpu.vector_store %arg8[%66, %c0_38], %65 {strides = array<i32>} : memref<256x32xf32, #tpu.memory_space<vmem>>, vector<128x16xf32>,
        %c0_39 = arith.constant 0 : index
        %c0_40 = arith.constant 0 : index
        %68 = vector.load %arg9[%c0_39, %c0_40] : memref<1x16xf32, #tpu.memory_space<vmem>>, vector<1x16xf32>
        %cst_41 = arith.constant dense<0.000000e+00> : vector<16xf32>
        %69 = vector.multi_reduction <add>, %65, %cst_41 [0] : vector<128x16xf32> to vector<16xf32>
        %70 = vector.shape_cast %69 : vector<16xf32> to vector<1x16xf32>
        %71 = arith.addf %68, %70 : vector<1x16xf32>
        %c0_42 = arith.constant 0 : index
        %c0_43 = arith.constant 0 : index
        %72 = vector.load %arg9[%c0_42, %c0_43] : memref<1x16xf32, #tpu.memory_space<vmem>>, vector<1x16xf32>
        tpu.vector_store %arg9[%c0_42, %c0_43], %71 {strides = array<i32>} : memref<1x16xf32, #tpu.memory_space<vmem>>, vector<1x16xf32>,
        %c0_44 = arith.constant 0 : index
        %c0_45 = arith.constant 0 : index
        %73 = vector.load %arg10[%c0_44, %c0_45] : memref<1x16xf32, #tpu.memory_space<vmem>>, vector<1x16xf32>
        %74 = arith.mulf %65, %65 : vector<128x16xf32>
        %cst_46 = arith.constant dense<0.000000e+00> : vector<16xf32>
        %75 = vector.multi_reduction <add>, %74, %cst_46 [0] : vector<128x16xf32> to vector<16xf32>
        %76 = vector.shape_cast %75 : vector<16xf32> to vector<1x16xf32>
        %77 = arith.addf %73, %76 : vector<1x16xf32>
        %c0_47 = arith.constant 0 : index
        %c0_48 = arith.constant 0 : index
        %78 = vector.load %arg10[%c0_47, %c0_48] : memref<1x16xf32, #tpu.memory_space<vmem>>, vector<1x16xf32>
        tpu.vector_store %arg10[%c0_47, %c0_48], %77 {strides = array<i32>} : memref<1x16xf32, #tpu.memory_space<vmem>>, vector<1x16xf32>,
        %c2_i32_49 = arith.constant 2 : i32
      } else {
      }
    } else {
    }
    %c1_i32 = arith.constant 1 : i32
    %17 = arith.cmpi eq, %arg0, %c1_i32 : i32
    %18 = arith.extui %17 : i1 to i32
    %c0_i32_12 = arith.constant 0 : i32
    %19 = arith.cmpi ne, %18, %c0_i32_12 : i32
    scf.if %19 {
      %c0_14 = arith.constant 0 : index
      %c0_15 = arith.constant 0 : index
      %23 = vector.load %arg9[%c0_14, %c0_15] : memref<1x16xf32, #tpu.memory_space<vmem>>, vector<1x16xf32>
      %cst = arith.constant 5.000000e-03 : f32
      %24 = vector.broadcast %cst : f32 to vector<1x16xf32>
      %25 = arith.mulf %23, %24 : vector<1x16xf32>
      %c0_16 = arith.constant 0 : index
      %c0_17 = arith.constant 0 : index
      %26 = vector.load %arg10[%c0_16, %c0_17] : memref<1x16xf32, #tpu.memory_space<vmem>>, vector<1x16xf32>
      %cst_18 = arith.constant 5.000000e-03 : f32
      %27 = vector.broadcast %cst_18 : f32 to vector<1x16xf32>
      %28 = arith.mulf %26, %27 : vector<1x16xf32>
      %29 = arith.mulf %25, %25 : vector<1x16xf32>
      %30 = arith.subf %28, %29 : vector<1x16xf32>
      %cst_19 = arith.constant 9.99999974E-6 : f32
      %31 = vector.broadcast %cst_19 : f32 to vector<1x16xf32>
      %32 = arith.addf %30, %31 : vector<1x16xf32>
      %33 = math.rsqrt %32 : vector<1x16xf32>
      %34 = arith.mulf %2, %33 : vector<1x16xf32>
      %35 = arith.mulf %25, %34 : vector<1x16xf32>
      %36 = arith.subf %3, %35 : vector<1x16xf32>
      %c0_20 = arith.constant 0 : index
      %c0_21 = arith.constant 0 : index
      %37 = vector.load %arg4[%c0_20, %c0_21] : memref<16x8xf32, #tpu.memory_space<vmem>>, vector<16x8xf32>
      %cst_22 = arith.constant dense<0.000000e+00> : vector<1x8xf32>
      %38 = tpu.matmul %36, %37, %cst_22 {dimension_numbers = #tpu.dot_dimension_numbers<[1], [0], [0], [1], [0, 0, 1, 1], [], []>} : vector<1x16xf32>, vector<16x8xf32>, vector<1x8xf32> -> vector<1x8xf32>
      %39 = arith.addf %38, %4 : vector<1x8xf32>
      %40 = arith.extui %8 : i1 to i32
      %c0_i32_23 = arith.constant 0 : i32
      %41 = arith.cmpi ne, %40, %c0_i32_23 : i32
      scf.if %41 {
        %c0_i32_26 = arith.constant 0 : i32
        %c128_i32 = arith.constant 128 : i32
        %45 = arith.muli %c0_i32_26, %c128_i32 : i32
        %46 = tpu.assume_multiple %45, 128 : i32
        %47 = arith.addi %0, %46 : i32
        %48 = tpu.assume_multiple %47, 128 : i32
        %49 = arith.index_cast %48 : i32 to index
        %c0_27 = arith.constant 0 : index
        %50 = vector.load %arg8[%49, %c0_27] : memref<256x32xf32, #tpu.memory_space<vmem>>, vector<128x16xf32>
        %51 = vector.broadcast %34 : vector<1x16xf32> to vector<128x16xf32>
        %52 = arith.mulf %50, %51 : vector<128x16xf32>
        %cst_28 = arith.constant dense<0.000000e+00> : vector<128x8xf32>
        %53 = tpu.matmul %52, %37, %cst_28 {dimension_numbers = #tpu.dot_dimension_numbers<[1], [0], [0], [1], [0, 0, 1, 1], [], []>} : vector<128x16xf32>, vector<16x8xf32>, vector<128x8xf32> -> vector<128x8xf32>
        %54 = vector.broadcast %39 : vector<1x8xf32> to vector<128x8xf32>
        %55 = arith.addf %53, %54 : vector<128x8xf32>
        %cst_29 = arith.constant 0.000000e+00 : f32
        %56 = vector.broadcast %cst_29 : f32 to vector<128x8xf32>
        %57 = arith.maximumf %55, %56 : vector<128x8xf32>
        %58 = arith.index_cast %48 : i32 to index
        %c16 = arith.constant 16 : index
        %59 = vector.load %arg8[%58, %c16] : memref<256x32xf32, #tpu.memory_space<vmem>>, vector<128x8xf32>
        tpu.vector_store %arg8[%58, %c16], %57 {strides = array<i32>} : memref<256x32xf32, #tpu.memory_space<vmem>>, vector<128x8xf32>,
        %60 = arith.addi %0, %46 : i32
        %61 = tpu.iota {dimensions = array<i32: 0>} : vector<128x1xi32>
        %62 = vector.broadcast %60 : i32 to vector<128x1xi32>
        %63 = arith.addi %62, %61 : vector<128x1xi32>
        %c200_i32 = arith.constant 200 : i32
        %64 = vector.broadcast %c200_i32 : i32 to vector<128x1xi32>
        %65 = arith.cmpi slt, %63, %64 : vector<128x1xi32>
        %cst_30 = arith.constant 0.000000e+00 : f32
        %66 = vector.shape_cast %65 : vector<128x1xi1> to vector<128x1xi1>
        %67 = vector.broadcast %66 : vector<128x1xi1> to vector<128x8xi1>
        %68 = vector.broadcast %cst_30 : f32 to vector<128x8xf32>
        %69 = arith.select %67, %57, %68 : vector<128x8xi1>, vector<128x8xf32>
        %c0_31 = arith.constant 0 : index
        %c0_32 = arith.constant 0 : index
        %70 = vector.load %arg11[%c0_31, %c0_32] : memref<1x8xf32, #tpu.memory_space<vmem>>, vector<1x8xf32>
        %cst_33 = arith.constant dense<0.000000e+00> : vector<8xf32>
        %71 = vector.multi_reduction <add>, %69, %cst_33 [0] : vector<128x8xf32> to vector<8xf32>
        %72 = vector.shape_cast %71 : vector<8xf32> to vector<1x8xf32>
        %73 = arith.addf %70, %72 : vector<1x8xf32>
        %c0_34 = arith.constant 0 : index
        %c0_35 = arith.constant 0 : index
        %74 = vector.load %arg11[%c0_34, %c0_35] : memref<1x8xf32, #tpu.memory_space<vmem>>, vector<1x8xf32>
        tpu.vector_store %arg11[%c0_34, %c0_35], %73 {strides = array<i32>} : memref<1x8xf32, #tpu.memory_space<vmem>>, vector<1x8xf32>,
        %c0_36 = arith.constant 0 : index
        %c0_37 = arith.constant 0 : index
        %75 = vector.load %arg12[%c0_36, %c0_37] : memref<1x8xf32, #tpu.memory_space<vmem>>, vector<1x8xf32>
        %76 = arith.mulf %69, %69 : vector<128x8xf32>
        %cst_38 = arith.constant dense<0.000000e+00> : vector<8xf32>
        %77 = vector.multi_reduction <add>, %76, %cst_38 [0] : vector<128x8xf32> to vector<8xf32>
        %78 = vector.shape_cast %77 : vector<8xf32> to vector<1x8xf32>
        %79 = arith.addf %75, %78 : vector<1x8xf32>
        %c0_39 = arith.constant 0 : index
        %c0_40 = arith.constant 0 : index
        %80 = vector.load %arg12[%c0_39, %c0_40] : memref<1x8xf32, #tpu.memory_space<vmem>>, vector<1x8xf32>
        tpu.vector_store %arg12[%c0_39, %c0_40], %79 {strides = array<i32>} : memref<1x8xf32, #tpu.memory_space<vmem>>, vector<1x8xf32>,
        %c1_i32_41 = arith.constant 1 : i32
        %c128_i32_42 = arith.constant 128 : i32
        %81 = arith.muli %c1_i32_41, %c128_i32_42 : i32
        %82 = tpu.assume_multiple %81, 128 : i32
        %83 = arith.addi %0, %82 : i32
        %84 = tpu.assume_multiple %83, 128 : i32
        %85 = arith.index_cast %84 : i32 to index
        %c0_43 = arith.constant 0 : index
        %86 = vector.load %arg8[%85, %c0_43] : memref<256x32xf32, #tpu.memory_space<vmem>>, vector<128x16xf32>
        %87 = vector.broadcast %34 : vector<1x16xf32> to vector<128x16xf32>
        %88 = arith.mulf %86, %87 : vector<128x16xf32>
        %cst_44 = arith.constant dense<0.000000e+00> : vector<128x8xf32>
        %89 = tpu.matmul %88, %37, %cst_44 {dimension_numbers = #tpu.dot_dimension_numbers<[1], [0], [0], [1], [0, 0, 1, 1], [], []>} : vector<128x16xf32>, vector<16x8xf32>, vector<128x8xf32> -> vector<128x8xf32>
        %90 = vector.broadcast %39 : vector<1x8xf32> to vector<128x8xf32>
        %91 = arith.addf %89, %90 : vector<128x8xf32>
        %cst_45 = arith.constant 0.000000e+00 : f32
        %92 = vector.broadcast %cst_45 : f32 to vector<128x8xf32>
        %93 = arith.maximumf %91, %92 : vector<128x8xf32>
        %94 = arith.index_cast %84 : i32 to index
        %c16_46 = arith.constant 16 : index
        %95 = vector.load %arg8[%94, %c16_46] : memref<256x32xf32, #tpu.memory_space<vmem>>, vector<128x8xf32>
        tpu.vector_store %arg8[%94, %c16_46], %93 {strides = array<i32>} : memref<256x32xf32, #tpu.memory_space<vmem>>, vector<128x8xf32>,
        %96 = arith.addi %0, %82 : i32
        %97 = tpu.iota {dimensions = array<i32: 0>} : vector<128x1xi32>
        %98 = vector.broadcast %96 : i32 to vector<128x1xi32>
        %99 = arith.addi %98, %97 : vector<128x1xi32>
        %c200_i32_47 = arith.constant 200 : i32
        %100 = vector.broadcast %c200_i32_47 : i32 to vector<128x1xi32>
        %101 = arith.cmpi slt, %99, %100 : vector<128x1xi32>
        %cst_48 = arith.constant 0.000000e+00 : f32
        %102 = vector.shape_cast %101 : vector<128x1xi1> to vector<128x1xi1>
        %103 = vector.broadcast %102 : vector<128x1xi1> to vector<128x8xi1>
        %104 = vector.broadcast %cst_48 : f32 to vector<128x8xf32>
        %105 = arith.select %103, %93, %104 : vector<128x8xi1>, vector<128x8xf32>
        %c0_49 = arith.constant 0 : index
        %c0_50 = arith.constant 0 : index
        %106 = vector.load %arg11[%c0_49, %c0_50] : memref<1x8xf32, #tpu.memory_space<vmem>>, vector<1x8xf32>
        %cst_51 = arith.constant dense<0.000000e+00> : vector<8xf32>
        %107 = vector.multi_reduction <add>, %105, %cst_51 [0] : vector<128x8xf32> to vector<8xf32>
        %108 = vector.shape_cast %107 : vector<8xf32> to vector<1x8xf32>
        %109 = arith.addf %106, %108 : vector<1x8xf32>
        %c0_52 = arith.constant 0 : index
        %c0_53 = arith.constant 0 : index
        %110 = vector.load %arg11[%c0_52, %c0_53] : memref<1x8xf32, #tpu.memory_space<vmem>>, vector<1x8xf32>
        tpu.vector_store %arg11[%c0_52, %c0_53], %109 {strides = array<i32>} : memref<1x8xf32, #tpu.memory_space<vmem>>, vector<1x8xf32>,
        %c0_54 = arith.constant 0 : index
        %c0_55 = arith.constant 0 : index
        %111 = vector.load %arg12[%c0_54, %c0_55] : memref<1x8xf32, #tpu.memory_space<vmem>>, vector<1x8xf32>
        %112 = arith.mulf %105, %105 : vector<128x8xf32>
        %cst_56 = arith.constant dense<0.000000e+00> : vector<8xf32>
        %113 = vector.multi_reduction <add>, %112, %cst_56 [0] : vector<128x8xf32> to vector<8xf32>
        %114 = vector.shape_cast %113 : vector<8xf32> to vector<1x8xf32>
        %115 = arith.addf %111, %114 : vector<1x8xf32>
        %c0_57 = arith.constant 0 : index
        %c0_58 = arith.constant 0 : index
        %116 = vector.load %arg12[%c0_57, %c0_58] : memref<1x8xf32, #tpu.memory_space<vmem>>, vector<1x8xf32>
        tpu.vector_store %arg12[%c0_57, %c0_58], %115 {strides = array<i32>} : memref<1x8xf32, #tpu.memory_space<vmem>>, vector<1x8xf32>,
        %c2_i32_59 = arith.constant 2 : i32
      } else {
      }
      %c0_i32_24 = arith.constant 0 : i32
      %42 = arith.cmpi ne, %arg1, %c0_i32_24 : i32
      %43 = arith.extui %42 : i1 to i32
      %c0_i32_25 = arith.constant 0 : i32
      %44 = arith.cmpi ne, %43, %c0_i32_25 : i32
      scf.if %44 {
        %c0_i32_26 = arith.constant 0 : i32
        %c128_i32 = arith.constant 128 : i32
        %45 = arith.muli %c0_i32_26, %c128_i32 : i32
        %46 = tpu.assume_multiple %45, 128 : i32
        %47 = arith.addi %0, %46 : i32
        %48 = tpu.assume_multiple %47, 128 : i32
        %49 = arith.index_cast %48 : i32 to index
        %c0_27 = arith.constant 0 : index
        %50 = vector.load %arg8[%49, %c0_27] : memref<256x32xf32, #tpu.memory_space<vmem>>, vector<128x16xf32>
        %51 = vector.broadcast %34 : vector<1x16xf32> to vector<128x16xf32>
        %52 = arith.mulf %50, %51 : vector<128x16xf32>
        %cst_28 = arith.constant dense<0.000000e+00> : vector<128x8xf32>
        %53 = tpu.matmul %52, %37, %cst_28 {dimension_numbers = #tpu.dot_dimension_numbers<[1], [0], [0], [1], [0, 0, 1, 1], [], []>} : vector<128x16xf32>, vector<16x8xf32>, vector<128x8xf32> -> vector<128x8xf32>
        %54 = vector.broadcast %39 : vector<1x8xf32> to vector<128x8xf32>
        %55 = arith.addf %53, %54 : vector<128x8xf32>
        %cst_29 = arith.constant 0.000000e+00 : f32
        %56 = vector.broadcast %cst_29 : f32 to vector<128x8xf32>
        %57 = arith.maximumf %55, %56 : vector<128x8xf32>
        %58 = arith.index_cast %48 : i32 to index
        %c16 = arith.constant 16 : index
        %59 = vector.load %arg8[%58, %c16] : memref<256x32xf32, #tpu.memory_space<vmem>>, vector<128x8xf32>
        tpu.vector_store %arg8[%58, %c16], %57 {strides = array<i32>} : memref<256x32xf32, #tpu.memory_space<vmem>>, vector<128x8xf32>,
        %c0_30 = arith.constant 0 : index
        %c0_31 = arith.constant 0 : index
        %60 = vector.load %arg11[%c0_30, %c0_31] : memref<1x8xf32, #tpu.memory_space<vmem>>, vector<1x8xf32>
        %cst_32 = arith.constant dense<0.000000e+00> : vector<8xf32>
        %61 = vector.multi_reduction <add>, %57, %cst_32 [0] : vector<128x8xf32> to vector<8xf32>
        %62 = vector.shape_cast %61 : vector<8xf32> to vector<1x8xf32>
        %63 = arith.addf %60, %62 : vector<1x8xf32>
        %c0_33 = arith.constant 0 : index
        %c0_34 = arith.constant 0 : index
        %64 = vector.load %arg11[%c0_33, %c0_34] : memref<1x8xf32, #tpu.memory_space<vmem>>, vector<1x8xf32>
        tpu.vector_store %arg11[%c0_33, %c0_34], %63 {strides = array<i32>} : memref<1x8xf32, #tpu.memory_space<vmem>>, vector<1x8xf32>,
        %c0_35 = arith.constant 0 : index
        %c0_36 = arith.constant 0 : index
        %65 = vector.load %arg12[%c0_35, %c0_36] : memref<1x8xf32, #tpu.memory_space<vmem>>, vector<1x8xf32>
        %66 = arith.mulf %57, %57 : vector<128x8xf32>
        %cst_37 = arith.constant dense<0.000000e+00> : vector<8xf32>
        %67 = vector.multi_reduction <add>, %66, %cst_37 [0] : vector<128x8xf32> to vector<8xf32>
        %68 = vector.shape_cast %67 : vector<8xf32> to vector<1x8xf32>
        %69 = arith.addf %65, %68 : vector<1x8xf32>
        %c0_38 = arith.constant 0 : index
        %c0_39 = arith.constant 0 : index
        %70 = vector.load %arg12[%c0_38, %c0_39] : memref<1x8xf32, #tpu.memory_space<vmem>>, vector<1x8xf32>
        tpu.vector_store %arg12[%c0_38, %c0_39], %69 {strides = array<i32>} : memref<1x8xf32, #tpu.memory_space<vmem>>, vector<1x8xf32>,
        %c1_i32_40 = arith.constant 1 : i32
        %c128_i32_41 = arith.constant 128 : i32
        %71 = arith.muli %c1_i32_40, %c128_i32_41 : i32
        %72 = tpu.assume_multiple %71, 128 : i32
        %73 = arith.addi %0, %72 : i32
        %74 = tpu.assume_multiple %73, 128 : i32
        %75 = arith.index_cast %74 : i32 to index
        %c0_42 = arith.constant 0 : index
        %76 = vector.load %arg8[%75, %c0_42] : memref<256x32xf32, #tpu.memory_space<vmem>>, vector<128x16xf32>
        %77 = vector.broadcast %34 : vector<1x16xf32> to vector<128x16xf32>
        %78 = arith.mulf %76, %77 : vector<128x16xf32>
        %cst_43 = arith.constant dense<0.000000e+00> : vector<128x8xf32>
        %79 = tpu.matmul %78, %37, %cst_43 {dimension_numbers = #tpu.dot_dimension_numbers<[1], [0], [0], [1], [0, 0, 1, 1], [], []>} : vector<128x16xf32>, vector<16x8xf32>, vector<128x8xf32> -> vector<128x8xf32>
        %80 = vector.broadcast %39 : vector<1x8xf32> to vector<128x8xf32>
        %81 = arith.addf %79, %80 : vector<128x8xf32>
        %cst_44 = arith.constant 0.000000e+00 : f32
        %82 = vector.broadcast %cst_44 : f32 to vector<128x8xf32>
        %83 = arith.maximumf %81, %82 : vector<128x8xf32>
        %84 = arith.index_cast %74 : i32 to index
        %c16_45 = arith.constant 16 : index
        %85 = vector.load %arg8[%84, %c16_45] : memref<256x32xf32, #tpu.memory_space<vmem>>, vector<128x8xf32>
        tpu.vector_store %arg8[%84, %c16_45], %83 {strides = array<i32>} : memref<256x32xf32, #tpu.memory_space<vmem>>, vector<128x8xf32>,
        %c0_46 = arith.constant 0 : index
        %c0_47 = arith.constant 0 : index
        %86 = vector.load %arg11[%c0_46, %c0_47] : memref<1x8xf32, #tpu.memory_space<vmem>>, vector<1x8xf32>
        %cst_48 = arith.constant dense<0.000000e+00> : vector<8xf32>
        %87 = vector.multi_reduction <add>, %83, %cst_48 [0] : vector<128x8xf32> to vector<8xf32>
        %88 = vector.shape_cast %87 : vector<8xf32> to vector<1x8xf32>
        %89 = arith.addf %86, %88 : vector<1x8xf32>
        %c0_49 = arith.constant 0 : index
        %c0_50 = arith.constant 0 : index
        %90 = vector.load %arg11[%c0_49, %c0_50] : memref<1x8xf32, #tpu.memory_space<vmem>>, vector<1x8xf32>
        tpu.vector_store %arg11[%c0_49, %c0_50], %89 {strides = array<i32>} : memref<1x8xf32, #tpu.memory_space<vmem>>, vector<1x8xf32>,
        %c0_51 = arith.constant 0 : index
        %c0_52 = arith.constant 0 : index
        %91 = vector.load %arg12[%c0_51, %c0_52] : memref<1x8xf32, #tpu.memory_space<vmem>>, vector<1x8xf32>
        %92 = arith.mulf %83, %83 : vector<128x8xf32>
        %cst_53 = arith.constant dense<0.000000e+00> : vector<8xf32>
        %93 = vector.multi_reduction <add>, %92, %cst_53 [0] : vector<128x8xf32> to vector<8xf32>
        %94 = vector.shape_cast %93 : vector<8xf32> to vector<1x8xf32>
        %95 = arith.addf %91, %94 : vector<1x8xf32>
        %c0_54 = arith.constant 0 : index
        %c0_55 = arith.constant 0 : index
        %96 = vector.load %arg12[%c0_54, %c0_55] : memref<1x8xf32, #tpu.memory_space<vmem>>, vector<1x8xf32>
        tpu.vector_store %arg12[%c0_54, %c0_55], %95 {strides = array<i32>} : memref<1x8xf32, #tpu.memory_space<vmem>>, vector<1x8xf32>,
        %c2_i32_56 = arith.constant 2 : i32
      } else {
      }
    } else {
    }
    %c2_i32 = arith.constant 2 : i32
    %20 = arith.cmpi eq, %arg0, %c2_i32 : i32
    %21 = arith.extui %20 : i1 to i32
    %c0_i32_13 = arith.constant 0 : i32
    %22 = arith.cmpi ne, %21, %c0_i32_13 : i32
    scf.if %22 {
      %c0_14 = arith.constant 0 : index
      %c0_15 = arith.constant 0 : index
      %23 = vector.load %arg11[%c0_14, %c0_15] : memref<1x8xf32, #tpu.memory_space<vmem>>, vector<1x8xf32>
      %cst = arith.constant 5.000000e-03 : f32
      %24 = vector.broadcast %cst : f32 to vector<1x8xf32>
      %25 = arith.mulf %23, %24 : vector<1x8xf32>
      %c0_16 = arith.constant 0 : index
      %c0_17 = arith.constant 0 : index
      %26 = vector.load %arg12[%c0_16, %c0_17] : memref<1x8xf32, #tpu.memory_space<vmem>>, vector<1x8xf32>
      %cst_18 = arith.constant 5.000000e-03 : f32
      %27 = vector.broadcast %cst_18 : f32 to vector<1x8xf32>
      %28 = arith.mulf %26, %27 : vector<1x8xf32>
      %29 = arith.mulf %25, %25 : vector<1x8xf32>
      %30 = arith.subf %28, %29 : vector<1x8xf32>
      %cst_19 = arith.constant 9.99999974E-6 : f32
      %31 = vector.broadcast %cst_19 : f32 to vector<1x8xf32>
      %32 = arith.addf %30, %31 : vector<1x8xf32>
      %33 = math.rsqrt %32 : vector<1x8xf32>
      %34 = arith.mulf %5, %33 : vector<1x8xf32>
      %35 = arith.mulf %25, %34 : vector<1x8xf32>
      %36 = arith.subf %6, %35 : vector<1x8xf32>
      %c0_20 = arith.constant 0 : index
      %c0_21 = arith.constant 0 : index
      %37 = vector.load %arg5[%c0_20, %c0_21] : memref<8x2xf32, #tpu.memory_space<vmem>>, vector<8x2xf32>
      %cst_22 = arith.constant dense<0.000000e+00> : vector<1x2xf32>
      %38 = tpu.matmul %36, %37, %cst_22 {dimension_numbers = #tpu.dot_dimension_numbers<[1], [0], [0], [1], [0, 0, 1, 1], [], []>} : vector<1x8xf32>, vector<8x2xf32>, vector<1x2xf32> -> vector<1x2xf32>
      %39 = arith.addf %38, %7 : vector<1x2xf32>
      %c0_i32_23 = arith.constant 0 : i32
      %c128_i32 = arith.constant 128 : i32
      %40 = arith.muli %c0_i32_23, %c128_i32 : i32
      %41 = tpu.assume_multiple %40, 128 : i32
      %42 = arith.addi %0, %41 : i32
      %43 = tpu.assume_multiple %42, 128 : i32
      %44 = arith.index_cast %43 : i32 to index
      %c16 = arith.constant 16 : index
      %45 = vector.load %arg8[%44, %c16] : memref<256x32xf32, #tpu.memory_space<vmem>>, vector<128x8xf32>
      %46 = vector.broadcast %34 : vector<1x8xf32> to vector<128x8xf32>
      %47 = arith.mulf %45, %46 : vector<128x8xf32>
      %cst_24 = arith.constant dense<0.000000e+00> : vector<128x2xf32>
      %48 = tpu.matmul %47, %37, %cst_24 {dimension_numbers = #tpu.dot_dimension_numbers<[1], [0], [0], [1], [0, 0, 1, 1], [], []>} : vector<128x8xf32>, vector<8x2xf32>, vector<128x2xf32> -> vector<128x2xf32>
      %49 = vector.broadcast %39 : vector<1x2xf32> to vector<128x2xf32>
      %50 = arith.addf %48, %49 : vector<128x2xf32>
      %51 = arith.index_cast %41 : i32 to index
      %c0_25 = arith.constant 0 : index
      %52 = vector.load %arg7[%51, %c0_25] : memref<256x2xf32, #tpu.memory_space<vmem>>, vector<128x2xf32>
      tpu.vector_store %arg7[%51, %c0_25], %50 {strides = array<i32>} : memref<256x2xf32, #tpu.memory_space<vmem>>, vector<128x2xf32>,
      %c1_i32_26 = arith.constant 1 : i32
      %c128_i32_27 = arith.constant 128 : i32
      %53 = arith.muli %c1_i32_26, %c128_i32_27 : i32
      %54 = tpu.assume_multiple %53, 128 : i32
      %55 = arith.addi %0, %54 : i32
      %56 = tpu.assume_multiple %55, 128 : i32
      %57 = arith.index_cast %56 : i32 to index
      %c16_28 = arith.constant 16 : index
      %58 = vector.load %arg8[%57, %c16_28] : memref<256x32xf32, #tpu.memory_space<vmem>>, vector<128x8xf32>
      %59 = vector.broadcast %34 : vector<1x8xf32> to vector<128x8xf32>
      %60 = arith.mulf %58, %59 : vector<128x8xf32>
      %cst_29 = arith.constant dense<0.000000e+00> : vector<128x2xf32>
      %61 = tpu.matmul %60, %37, %cst_29 {dimension_numbers = #tpu.dot_dimension_numbers<[1], [0], [0], [1], [0, 0, 1, 1], [], []>} : vector<128x8xf32>, vector<8x2xf32>, vector<128x2xf32> -> vector<128x2xf32>
      %62 = vector.broadcast %39 : vector<1x2xf32> to vector<128x2xf32>
      %63 = arith.addf %61, %62 : vector<128x2xf32>
      %64 = arith.index_cast %54 : i32 to index
      %c0_30 = arith.constant 0 : index
      %65 = vector.load %arg7[%64, %c0_30] : memref<256x2xf32, #tpu.memory_space<vmem>>, vector<128x2xf32>
      tpu.vector_store %arg7[%64, %c0_30], %63 {strides = array<i32>} : memref<256x2xf32, #tpu.memory_space<vmem>>, vector<128x2xf32>,
      %c2_i32_31 = arith.constant 2 : i32
    } else {
    }
    return
  }
  func.func @transform_0(%arg0: i32, %arg1: i32) -> (i32, i32) {
    %c0_i32 = arith.constant 0 : i32
    %0 = arith.cmpi eq, %arg0, %c0_i32 : i32
    %c0_i32_0 = arith.constant 0 : i32
    %1 = arith.select %0, %arg1, %c0_i32_0 : i32
    %c0_i32_1 = arith.constant 0 : i32
    %c0_i32_2 = arith.constant 0 : i32
    return %1, %c0_i32_1 : i32, i32
  }
  func.func @transform_1(%arg0: i32, %arg1: i32) -> (i32, i32) {
    %c0_i32 = arith.constant 0 : i32
    %c0_i32_0 = arith.constant 0 : i32
    %c0_i32_1 = arith.constant 0 : i32
    return %c0_i32, %c0_i32_0 : i32, i32
  }
  func.func @transform_2(%arg0: i32, %arg1: i32) -> (i32, i32) {
    %c0_i32 = arith.constant 0 : i32
    %c0_i32_0 = arith.constant 0 : i32
    %c0_i32_1 = arith.constant 0 : i32
    return %c0_i32, %c0_i32_0 : i32, i32
  }
  func.func @transform_3(%arg0: i32, %arg1: i32) -> (i32, i32) {
    %c0_i32 = arith.constant 0 : i32
    %c0_i32_0 = arith.constant 0 : i32
    %c0_i32_1 = arith.constant 0 : i32
    return %c0_i32, %c0_i32_0 : i32, i32
  }
  func.func @transform_4(%arg0: i32, %arg1: i32) -> (i32, i32) {
    %c0_i32 = arith.constant 0 : i32
    %c0_i32_0 = arith.constant 0 : i32
    %c0_i32_1 = arith.constant 0 : i32
    return %c0_i32, %c0_i32_0 : i32, i32
  }
  func.func @transform_5(%arg0: i32, %arg1: i32) -> (i32, i32) {
    %c2_i32 = arith.constant 2 : i32
    %0 = arith.cmpi eq, %arg0, %c2_i32 : i32
    %c0_i32 = arith.constant 0 : i32
    %1 = arith.select %0, %arg1, %c0_i32 : i32
    %c0_i32_0 = arith.constant 0 : i32
    %c0_i32_1 = arith.constant 0 : i32
    return %1, %c0_i32_0 : i32, i32
  }
}

</mosaic_0001>

<bundles_post_ra>
// kernel: tpu_custom_call.1
= control target key start
LH: loop header
LB: loop body
LE: loop exit
PB: predicated region body
PF: predicated region fallthrough
CT: control target
= control target key end

     0   :  { %s5329_s18 = smov 0   ;;  %s5331_s19 = smov 0   ;;  %s6215_s0 = inlined_call_operand.vmem [shape: f32[200,32], index: 0, kind: input, shape index: {}]   ;;  %s6216_s1 = inlined_call_operand.vmem [shape: bf16[32,16], index: 1, kind: input, shape index: {}]   ;;  %s6217_s2 = inlined_call_operand.vmem [shape: f32[16,8], index: 2, kind: input, shape index: {}]   ;;  %s6218_s3 = inlined_call_operand.vmem [shape: f32[8,2], index: 3, kind: input, shape index: {}]   ;;  %s6219_s4 = inlined_call_operand.vmem [shape: f32[8,16], index: 4, kind: input, shape index: {}]   ;;  %s6220_s5 = inlined_call_operand.vmem [shape: f32[200,2], index: 5, kind: output, shape index: {}]  }
   0x1   :  { %s5333_s20 = smov 0  }
   0x2 LB: > { %s4595_s21 = sadd.s32 4294967295, %s5284_s20   ;;  %s27_s22 = sadd.s32 1, %s5280_s19  ;;  %s5284_s20 = sphi %s5333_s20, %s15_s20   ;;  %s5280_s19 = sphi %s5331_s19, %s6222_s19   ;;  %s5276_s18 = sphi %s5329_s18, %s6221_s18  }
   0x3   : > { %p29_p0 = scmp.ge.s32.totalorder %s27_s22, 3  ;;  %p4600_p1 = scmp.ge.s32.totalorder %s5284_s20, 1 }
   0x4   : > { %p216_p2 = scmp.lt.s32.totalorder %s5284_s20, 4 }
   0x5   : > { %s6224_s22 = smov (%p29_p0, %s27_s22), 0 }
   0x6   : > { %p217_p3 = pnand %p4600_p1, %p216_p2 }
   0x7   : > { %v5353_v0 = vld [vmem:[%s6219_s4] ss:$0 sm:$0xff] (!%p217_p3)  ;;  %v5358_v1 = vld [vmem:[%s6219_s4 + $0x1] sm:$0x1] (!%p217_p3)  ;;  %v5363_v2 = vld [vmem:[%s6219_s4 + $0x2] sm:$0x1] (!%p217_p3) }
   0x8   : > { %220 = sbr.rel (%p217_p3) target bundleno = 1300 (0x514), region = 40  ;;  %v5368_v3 = vld [vmem:[%s6219_s4 + $0x3] sm:$0x1] (!%p217_p3)  ;;  %v5373_v4 = vld [vmem:[%s6219_s4 + $0x4] sm:$0x1] (!%p217_p3)  ;;  %p276_p4 = scmp.eq.s32.totalorder (!%p217_p3), %s5276_s18, 0 }
   0x9   : > { %v5378_v5 = vld [vmem:[%s6219_s4 + $0x5] sm:$0x1] (!%p217_p3)  ;;  %v5383_v6 = vld [vmem:[%s6219_s4 + $0x6] sm:$0x1] (!%p217_p3) }
   0xf   : > { %280 = sbr.rel (!%p276_p4) target bundleno = 22 (0x16), region = 44  ;;  %vm281_vm0 = vcmask (%p276_p4), 122880   ;;  %vm284_vm1 = vcmask (%p276_p4), 57344   ;;  %v5290_v7 = vmov (%p276_p4), 0.0  }
  0x10   : > { %282 = vst.msk [vmem:[#allocation3] sm:$0x1] (%p276_p4), %vm281_vm0, %v5290_v7  ;;  %283 = vst.msk [vmem:[#allocation4] sm:$0x1] (%p276_p4), %vm281_vm0, %v5290_v7 }
  0x11   : > { %285 = vst.msk [vmem:[#allocation5] sm:$0x1] (%p276_p4), %vm284_vm1, %v5290_v7  ;;  %286 = vst.msk [vmem:[#allocation6] sm:$0x1] (%p276_p4), %vm284_vm1, %v5290_v7 }
  0x16 PF: > { %p4602_p5 = scmp.ne.s32.totalorder %s5276_s18, 0 }
  0x17   : > { %v5240_v8 = vld [vmem:[%s6216_s1] sm:$0xff] (!%p4602_p5)   ;;  %v5241_v9 = vld [vmem:[%s6216_s1 + $0x8] sm:$0xff] (!%p4602_p5)   ;;  %vm338_vm2 = vcmask (!%p4602_p5), 261120   ;;  %v300_v13 = vld [vmem:[%s6215_s0 + $0x10] sm:$0xff] (!%p4602_p5)  ;;  %vm477_vm3 = vcmask (!%p4602_p5), 130048   ;;  %vm631_vm4 = vcmask (!%p4602_p5), 122880  }
  0x18   : > { %289 = sbr.rel (%p4602_p5) target bundleno = 318 (0x13e), region = 48  ;;  %5004 = vmatprep.subr.bf16.mxu0 (!%p4602_p5), %v5240_v8  ;;  %v298_v10 = vld [vmem:[%s6215_s0] sm:$0xff] (!%p4602_p5)  ;;  %v299_v11 = vld [vmem:[%s6215_s0 + $0x8] sm:$0xff] (!%p4602_p5)  ;;  %5024 = vmatprep.subr.bf16.mxu1 (!%p4602_p5), %v5240_v8  ;;  %v301_v14 = vld [vmem:[%s6215_s0 + $0x18] sm:$0xff] (!%p4602_p5) }
  0x19   : > { %5005 = vmatpush3.bf16.msra.mxu0 (!%p4602_p5), %v5240_v8  ;;  %v314_v12 = vpack.c.bf16 (!%p4602_p5), %v299_v11, %v298_v10  ;;  %5025 = vmatpush3.bf16.msra.mxu1 (!%p4602_p5), %v5240_v8  ;;  %v302_v15 = vld [vmem:[%s6215_s0 + $0x20] sm:$0xff] (!%p4602_p5)  ;;  %v303_v16 = vld [vmem:[%s6215_s0 + $0x28] sm:$0xff] (!%p4602_p5)  ;;  %v4615_v19 = vld [vmem:[%s6215_s0 + $0x90] sm:$0xff] (!%p4602_p5)  ;;  %v315_v21 = vpack.c.bf16 (!%p4602_p5), %v301_v14, %v300_v13 }
  0x1a   : > { %5006 = vmatprep.subr.bf16.mxu0 (!%p4602_p5), %v5241_v9  ;;  %5026 = vmatprep.subr.bf16.mxu1 (!%p4602_p5), %v5241_v9  ;;  %v4613_v17 = vld [vmem:[%s6215_s0 + $0x80] sm:$0xff] (!%p4602_p5)  ;;  %v4614_v18 = vld [vmem:[%s6215_s0 + $0x88] sm:$0xff] (!%p4602_p5)  ;;  %v4616_v20 = vld [vmem:[%s6215_s0 + $0x98] sm:$0xff] (!%p4602_p5)  ;;  %v316_v24 = vpack.c.bf16 (!%p4602_p5), %v303_v16, %v302_v15 }
  0x1b   : > { %5008 = vmatprep.mubr.msk.bf16.mxu0 (!%p4602_p5), %vm338_vm2, %v314_v12  ;;  %v707_v22 = vpack.c.bf16 (!%p4602_p5), %v4614_v18, %v4613_v17  ;;  %v708_v23 = vpack.c.bf16 (!%p4602_p5), %v4616_v20, %v4615_v19  ;;  %v4617_v25 = vld [vmem:[%s6215_s0 + $0xa0] sm:$0xff] (!%p4602_p5)  ;;  %v4618_v26 = vld [vmem:[%s6215_s0 + $0xa8] sm:$0xff] (!%p4602_p5)  ;;  %v304_v28 = vld [vmem:[%s6215_s0 + $0x30] sm:$0xff] (!%p4602_p5) }
  0x1c   : > { %v709_v27 = vpack.c.bf16 (!%p4602_p5), %v4618_v26, %v4617_v25  ;;  %v305_v29 = vld [vmem:[%s6215_s0 + $0x38] sm:$0xff] (!%p4602_p5)  ;;  %v306_v30 = vld [vmem:[%s6215_s0 + $0x40] sm:$0xff] (!%p4602_p5)  ;;  %v4619_v31 = vld [vmem:[%s6215_s0 + $0xb0] sm:$0xff] (!%p4602_p5) }
  0x1d   : > { %5007 = vmatpush3.bf16.msra.mxu0 (!%p4602_p5), %v5241_v9  ;;  %5027 = vmatpush3.bf16.msra.mxu1 (!%p4602_p5), %v5241_v9  ;;  %v4620_v32 = vld [vmem:[%s6215_s0 + $0xb8] sm:$0xff] (!%p4602_p5)  ;;  %v307_v33 = vld [vmem:[%s6215_s0 + $0x48] sm:$0xff] (!%p4602_p5)  ;;  %v4621_v34 = vld [vmem:[%s6215_s0 + $0xc0] sm:$0xff] (!%p4602_p5)  ;;  %v317_v36 = vpack.c.bf16 (!%p4602_p5), %v305_v29, %v304_v28 }
  0x1e   : > { %5028 = vmatprep.mubr.msk.bf16.mxu1 (!%p4602_p5), %vm338_vm2, %v707_v22  ;;  %v4622_v35 = vld [vmem:[%s6215_s0 + $0xc8] sm:$0xff] (!%p4602_p5)  ;;  %v710_v37 = vpack.c.bf16 (!%p4602_p5), %v4620_v32, %v4619_v31  ;;  %v318_v38 = vpack.c.bf16 (!%p4602_p5), %v307_v33, %v306_v30  ;;  %v308_v40 = vld [vmem:[%s6215_s0 + $0x50] sm:$0xff] (!%p4602_p5)  ;;  %v309_v41 = vld [vmem:[%s6215_s0 + $0x58] sm:$0xff] (!%p4602_p5) }
  0x1f   : > { %v711_v39 = vpack.c.bf16 %v4622_v35, %v4621_v34  ;;  %v310_v42 = vld [vmem:[%s6215_s0 + $0x60] sm:$0xff]  ;;  %v4623_v43 = vld [vmem:[%s6215_s0 + $0xd0] sm:$0xff]  ;;  %v4624_v44 = vld [vmem:[%s6215_s0 + $0xd8] sm:$0xff]  ;;  %v319_v48 = vpack.c.bf16 %v309_v41, %v308_v40 }
  0x20   : > { %5009 = vmatmul.mubr.msk.bf16.vlgmr.msra.gmra.mrb[0].mxu0 %vm338_vm2, %v315_v21  ;;  %5029 = vmatmul.mubr.msk.bf16.vlgmr.msra.gmra.mrb[0].mxu1 %vm338_vm2, %v708_v23  ;;  %v311_v45 = vld [vmem:[%s6215_s0 + $0x68] sm:$0xff]  ;;  %v4625_v46 = vld [vmem:[%s6215_s0 + $0xe0] sm:$0xff]  ;;  %v712_v49 = vpack.c.bf16 %v4624_v44, %v4623_v43  ;;  %v312_v52 = vld [vmem:[%s6215_s0 + $0x70] sm:$0xff] }
  0x21   : > { %5012 = vmatprep.mubr.msk.bf16.mxu0 %vm338_vm2, %v316_v24  ;;  %5032 = vmatprep.mubr.msk.bf16.mxu1 %vm338_vm2, %v709_v27  ;;  %v4626_v47 = vld [vmem:[%s6215_s0 + $0xe8] sm:$0xff]  ;;  %v320_v50 = vpack.c.bf16 %v311_v45, %v310_v42  ;;  %v313_v53 = vld [vmem:[%s6215_s0 + $0x78] sm:$0xff]  ;;  %v4627_v54 = vld [vmem:[%s6215_s0 + $0xf0] sm:$0xff] }
  0x22   : > { %v713_v51 = vpack.c.bf16 %v4626_v47, %v4625_v46  ;;  %v4628_v55 = vld [vmem:[%s6215_s0 + $0xf8] sm:$0xff]  ;;  %v321_v56 = vpack.c.bf16 %v313_v53, %v312_v52 }
  0x23   : > { %v714_v57 = vpack.c.bf16 %v4628_v55, %v4627_v54 }
  0x28   : > { %5013 = vmatmul.mubr.msk.bf16.gmra.mrb[4].mxu0 %vm338_vm2, %v317_v36  ;;  %5033 = vmatmul.mubr.msk.bf16.gmra.mrb[4].mxu1 %vm338_vm2, %v710_v37 }
  0x29   : > { %5016 = vmatprep.mubr.msk.bf16.mxu0 %vm338_vm2, %v318_v38  ;;  %5036 = vmatprep.mubr.msk.bf16.mxu1 %vm338_vm2, %v711_v39 }
  0x30   : > { %5017 = vmatmul.mubr.msk.bf16.gmra.mrb[8].mxu0 %vm338_vm2, %v319_v48  ;;  %5037 = vmatmul.mubr.msk.bf16.gmra.mrb[8].mxu1 %vm338_vm2, %v712_v49 }
  0x31   : > { %5020 = vmatprep.mubr.msk.bf16.mxu0 %vm338_vm2, %v320_v50  ;;  %5040 = vmatprep.mubr.msk.bf16.mxu1 %vm338_vm2, %v713_v51 }
  0x38   : > { %5021 = vmatmul.mubr.msk.bf16.gmra.mrb[12].mxu0 %vm338_vm2, %v321_v56  ;;  %5041 = vmatmul.mubr.msk.bf16.gmra.mrb[12].mxu1 %vm338_vm2, %v714_v57 }
  0xf3   : > { %v5010_v58 = vpop.f32.mrb[0].mxu0  ;;  %v5030_v59 = vpop.f32.mrb[0].mxu1 }
  0xf4   : > { %v406_v60 = vadd.f32 %v5010_v58, %v5353_v0  ;;  %v397_v61 = vpop.f32.mrb[1].mxu0  ;;  %v782_v62 = vadd.f32 %v5030_v59, %v5353_v0  ;;  %v773_v63 = vpop.f32.mrb[1].mxu1 }
  0xf5   : > { %v398_v7 = vadd.f32 %v5353_v0, %v397_v61  ;;  %v5011_v8 = vpop.f32.mrb[2].mxu0  ;;  %v774_v9 = vadd.f32 %v5353_v0, %v773_v63  ;;  %v5031_v10 = vpop.f32.mrb[2].mxu1 }
  0xf6   : > { %v462_v11 = vmax.f32 %v406_v60, 0.0  ;;  %v409_v12 = vadd.f32 %v5011_v8, %v5353_v0  ;;  %v400_v13 = vpop.f32.mrb[3].mxu0  ;;  %v838_v14 = vmax.f32 %v782_v62, 0.0  ;;  %v776_v15 = vpop.f32.mrb[3].mxu1  ;;  %v785_v19 = vadd.f32 %v5031_v10, %v5353_v0 }
  0xf7   : > { %v460_v16 = vmax.f32 %v398_v7, 0.0  ;;  %v401_v17 = vadd.f32 %v5353_v0, %v400_v13  ;;  %v836_v18 = vmax.f32 %v774_v9, 0.0  ;;  %v777_v23 = vadd.f32 %v5353_v0, %v776_v15 }
  0xf8   : > { %480 = vst.msk [vmem:[#allocation2 + $0x10] sm:$0xff] %vm477_vm3, %v462_v11  ;;  %v596_v20 = vsel %vm477_vm3, %v462_v11, 0.0  ;;  %v636_v21 = vmul.f32 %v462_v11, %v462_v11  ;;  %v463_v22 = vmax.f32 %v409_v12, 0.0  ;;  %4639 = vst.msk [vmem:[#allocation2 + $0x90] sm:$0xff] %vm477_vm3, %v838_v14  ;;  %v5518_v26 = vsel %vm477_vm3, %v838_v14, 0.0 }
  0xf9   : > { %478 = vst.msk [vmem:[#allocation2] sm:$0xff] %vm477_vm3, %v460_v16  ;;  %v634_v24 = vmul.f32 %v460_v16, %v460_v16  ;;  %v461_v25 = vmax.f32 %v401_v17, 0.0  ;;  %v993_v27 = vmul.f32 %v838_v14, %v838_v14  ;;  %4637 = vst.msk [vmem:[#allocation2 + $0x80] sm:$0xff] %vm477_vm3, %v836_v18  ;;  %v593_v29 = vsel %vm477_vm3, %v460_v16, 0.0 }
  0xfa   : > { %v653_v28 = vsel %vm477_vm3, %v636_v21, 0.0  ;;  %481 = vst.msk [vmem:[#allocation2 + $0x18] sm:$0xff] %vm477_vm3, %v463_v22  ;;  %v598_v30 = vsel %vm477_vm3, %v463_v22, 0.0  ;;  %v637_v31 = vmul.f32 %v463_v22, %v463_v22  ;;  %v951_v36 = vsel %vm477_vm3, %v836_v18, 0.0 }
  0xfb   : > { %v650_v32 = vsel %vm477_vm3, %v634_v24, 0.0  ;;  %479 = vst.msk [vmem:[#allocation2 + $0x8] sm:$0xff] %vm477_vm3, %v461_v25  ;;  %v594_v33 = vsel %vm477_vm3, %v461_v25, 0.0  ;;  %v635_v34 = vmul.f32 %v461_v25, %v461_v25  ;;  %v5014_v35 = vpop.f32.mrb[4].mxu0  ;;  %v5529_v37 = vpop.f32.mrb[4].mxu1  ;;  %v5533_v41 = vsel %vm477_vm3, %v993_v27, 0.0 }
  0xfc   : > { %v595_v38 = vadd.f32 %v594_v33, %v593_v29  ;;  %v422_v39 = vadd.f32 %v5014_v35, %v5353_v0  ;;  %v413_v40 = vpop.f32.mrb[5].mxu0  ;;  %v991_v42 = vmul.f32 %v836_v18, %v836_v18  ;;  %v5535_v43 = vpop.f32.mrb[5].mxu1  ;;  %v839_v47 = vmax.f32 %v785_v19, 0.0 }
  0xfd   : > { %v651_v44 = vsel %vm477_vm3, %v635_v34, 0.0  ;;  %v414_v45 = vadd.f32 %v5353_v0, %v413_v40  ;;  %v5015_v46 = vpop.f32.mrb[6].mxu0  ;;  %v837_v48 = vmax.f32 %v777_v23, 0.0  ;;  %v5539_v49 = vpop.f32.mrb[6].mxu1  ;;  %v655_v56 = vsel %vm477_vm3, %v637_v31, 0.0 }
  0xfe   : > { %v597_v50 = vadd.f32 %v596_v20, %v595_v38  ;;  %v652_v51 = vadd.f32 %v651_v44, %v650_v32  ;;  %v466_v52 = vmax.f32 %v422_v39, 0.0  ;;  %v425_v53 = vadd.f32 %v5015_v46, %v5353_v0  ;;  %v416_v54 = vpop.f32.mrb[7].mxu0  ;;  %v5542_v55 = vpop.f32.mrb[7].mxu1  ;;  %4640 = vst.msk [vmem:[#allocation2 + $0x98] sm:$0xff] %vm477_vm3, %v839_v47 }
  0xff   : > { %v464_v57 = vmax.f32 %v414_v45, 0.0  ;;  %v417_v58 = vadd.f32 %v5353_v0, %v416_v54  ;;  %v1007_v59 = vsel %vm477_vm3, %v991_v42, 0.0  ;;  %4638 = vst.msk [vmem:[#allocation2 + $0x88] sm:$0xff] %vm477_vm3, %v837_v48  ;;  %v5551_v63 = vsel %vm477_vm3, %v839_v47, 0.0 }
 0x100   : > { %v654_v60 = vadd.f32 %v653_v28, %v652_v51  ;;  %484 = vst.msk [vmem:[#allocation2 + $0x30] sm:$0xff] %vm477_vm3, %v466_v52  ;;  %v640_v61 = vmul.f32 %v466_v52, %v466_v52  ;;  %v599_v62 = vadd.f32 %v598_v30, %v597_v50  ;;  %v467_v9 = vmax.f32 %v425_v53, 0.0 }
 0x101   : > { %482 = vst.msk [vmem:[#allocation2 + $0x20] sm:$0xff] %vm477_vm3, %v464_v57  ;;  %v600_v7 = vsel %vm477_vm3, %v464_v57, 0.0  ;;  %v638_v8 = vmul.f32 %v464_v57, %v464_v57  ;;  %v465_v10 = vmax.f32 %v417_v58, 0.0  ;;  %v604_v11 = vsel %vm477_vm3, %v466_v52, 0.0 }
 0x102   : > { %v601_v12 = vadd.f32 %v600_v7, %v599_v62  ;;  %v656_v13 = vadd.f32 %v655_v56, %v654_v60  ;;  %v994_v14 = vmul.f32 %v839_v47, %v839_v47  ;;  %v661_v15 = vsel %vm477_vm3, %v640_v61, 0.0  ;;  %485 = vst.msk [vmem:[#allocation2 + $0x38] sm:$0xff] %vm477_vm3, %v467_v9 }
 0x103   : > { %v657_v16 = vsel %vm477_vm3, %v638_v8, 0.0  ;;  %v606_v17 = vsel %vm477_vm3, %v467_v9, 0.0  ;;  %483 = vst.msk [vmem:[#allocation2 + $0x28] sm:$0xff] %vm477_vm3, %v465_v10  ;;  %v602_v18 = vsel %vm477_vm3, %v465_v10, 0.0  ;;  %v5018_v19 = vpop.f32.mrb[8].mxu0  ;;  %v5562_v20 = vpop.f32.mrb[8].mxu1  ;;  %v641_v22 = vmul.f32 %v467_v9, %v467_v9 }
 0x104   : > { %v658_v21 = vadd.f32 %v657_v16, %v656_v13  ;;  %v603_v23 = vadd.f32 %v602_v18, %v601_v12  ;;  %v639_v24 = vmul.f32 %v465_v10, %v465_v10  ;;  %v429_v25 = vpop.f32.mrb[9].mxu0  ;;  %v5564_v27 = vpop.f32.mrb[9].mxu1  ;;  %v1012_v28 = vsel %vm477_vm3, %v994_v14, 0.0 }
 0x105   : > { %v952_v29 = vsel %vm477_vm3, %v837_v48, 0.0  ;;  %v992_v30 = vmul.f32 %v837_v48, %v837_v48  ;;  %v438_v31 = vadd.f32 %v5018_v19, %v5353_v0  ;;  %v5019_v32 = vpop.f32.mrb[10].mxu0  ;;  %v5569_v33 = vpop.f32.mrb[10].mxu1  ;;  %v430_v39 = vadd.f32 %v5353_v0, %v429_v25 }
 0x106   : > { %v605_v34 = vadd.f32 %v604_v11, %v603_v23  ;;  %v659_v35 = vsel %vm477_vm3, %v639_v24, 0.0  ;;  %v953_v38 = vadd.f32 %v952_v29, %v951_v36  ;;  %v432_v40 = vpop.f32.mrb[11].mxu0  ;;  %v5573_v42 = vpop.f32.mrb[11].mxu1  ;;  %v441_v47 = vadd.f32 %v5019_v32, %v5353_v0 }
 0x107   : > { %v660_v44 = vadd.f32 %v659_v35, %v658_v21  ;;  %v1008_v45 = vsel %vm477_vm3, %v992_v30, 0.0  ;;  %v470_v46 = vmax.f32 %v438_v31, 0.0  ;;  %v468_v51 = vmax.f32 %v430_v39, 0.0 }
 0x108   : > { %v955_v48 = vadd.f32 %v5518_v26, %v953_v38  ;;  %v1009_v50 = vadd.f32 %v1008_v45, %v1007_v59  ;;  %v607_v52 = vadd.f32 %v606_v17, %v605_v34  ;;  %v663_v53 = vsel %vm477_vm3, %v641_v22, 0.0 }
 0x109   : > { %v662_v54 = vadd.f32 %v661_v15, %v660_v44  ;;  %488 = vst.msk [vmem:[#allocation2 + $0x50] sm:$0xff] %vm477_vm3, %v470_v46  ;;  %v644_v36 = vmul.f32 %v470_v46, %v470_v46  ;;  %v471_v56 = vmax.f32 %v441_v47, 0.0  ;;  %486 = vst.msk [vmem:[#allocation2 + $0x40] sm:$0xff] %vm477_vm3, %v468_v51  ;;  %v608_v58 = vsel %vm477_vm3, %v468_v51, 0.0 }
 0x10a   : > { %v1011_v57 = vadd.f32 %v5533_v41, %v1009_v50  ;;  %v642_v60 = vmul.f32 %v468_v51, %v468_v51  ;;  %v433_v61 = vadd.f32 %v5353_v0, %v432_v40  ;;  %v612_v26 = vsel %vm477_vm3, %v470_v46, 0.0 }
 0x10b   : > { %v669_v59 = vsel %vm477_vm3, %v644_v36, 0.0  ;;  %v609_v62 = vadd.f32 %v608_v58, %v607_v52  ;;  %v664_v7 = vadd.f32 %v663_v53, %v662_v54  ;;  %489 = vst.msk [vmem:[#allocation2 + $0x58] sm:$0xff] %vm477_vm3, %v471_v56  ;;  %v5022_v8 = vpop.f32.mrb[12].mxu0  ;;  %v5587_v9 = vpop.f32.mrb[12].mxu1  ;;  %v645_v10 = vmul.f32 %v471_v56, %v471_v56 }
 0x10c   : > { %v665_v41 = vsel %vm477_vm3, %v642_v60, 0.0  ;;  %v469_v11 = vmax.f32 %v433_v61, 0.0  ;;  %v798_v12 = vadd.f32 %v5529_v37, %v5353_v0  ;;  %v445_v13 = vpop.f32.mrb[13].mxu0  ;;  %v5592_v14 = vpop.f32.mrb[13].mxu1  ;;  %v790_v16 = vadd.f32 %v5353_v0, %v5535_v43 }
 0x10d   : > { %v666_v15 = vadd.f32 %v665_v41, %v664_v7  ;;  %v957_v17 = vadd.f32 %v5551_v63, %v955_v48  ;;  %v1013_v18 = vadd.f32 %v1012_v28, %v1011_v57  ;;  %v5023_v19 = vpop.f32.mrb[14].mxu0  ;;  %v5597_v21 = vpop.f32.mrb[14].mxu1  ;;  %v614_v22 = vsel %vm477_vm3, %v471_v56, 0.0 }
 0x10e   : > { %487 = vst.msk [vmem:[#allocation2 + $0x48] sm:$0xff] %vm477_vm3, %v469_v11  ;;  %v610_v23 = vsel %vm477_vm3, %v469_v11, 0.0  ;;  %v643_v37 = vmul.f32 %v469_v11, %v469_v11  ;;  %v842_v24 = vmax.f32 %v798_v12, 0.0  ;;  %v448_v25 = vpop.f32.mrb[15].mxu0  ;;  %v5602_v29 = vpop.f32.mrb[15].mxu1  ;;  %v840_v31 = vmax.f32 %v790_v16, 0.0 }
 0x10f   : > { %v611_v30 = vadd.f32 %v610_v23, %v609_v62  ;;  %v801_v43 = vadd.f32 %v5539_v49, %v5353_v0  ;;  %v793_v63 = vadd.f32 %v5353_v0, %v5542_v55  ;;  %v671_v28 = vsel %vm477_vm3, %v645_v10, 0.0 }
 0x110   : > { %v667_v32 = vsel %vm477_vm3, %v643_v37, 0.0  ;;  %4643 = vst.msk [vmem:[#allocation2 + $0xb0] sm:$0xff] %vm477_vm3, %v842_v24  ;;  %v997_v34 = vmul.f32 %v842_v24, %v842_v24  ;;  %v454_v35 = vadd.f32 %v5022_v8, %v5353_v0  ;;  %4641 = vst.msk [vmem:[#allocation2 + $0xa0] sm:$0xff] %vm477_vm3, %v840_v31  ;;  %v958_v40 = vsel %vm477_vm3, %v840_v31, 0.0 }
 0x111   : > { %v613_v38 = vadd.f32 %v612_v26, %v611_v30  ;;  %v668_v39 = vadd.f32 %v667_v32, %v666_v15  ;;  %v995_v44 = vmul.f32 %v840_v31, %v840_v31  ;;  %v962_v49 = vsel %vm477_vm3, %v842_v24, 0.0 }
 0x112   : > { %v959_v45 = vadd.f32 %v958_v40, %v957_v17  ;;  %v843_v55 = vmax.f32 %v801_v43, 0.0  ;;  %v841_v46 = vmax.f32 %v793_v63, 0.0  ;;  %v474_v50 = vmax.f32 %v454_v35, 0.0 }
 0x113   : > { %v670_v47 = vadd.f32 %v669_v59, %v668_v39  ;;  %v1014_v48 = vsel %vm477_vm3, %v995_v44, 0.0  ;;  %v446_v51 = vadd.f32 %v5353_v0, %v445_v13  ;;  %v1018_v52 = vsel %vm477_vm3, %v997_v34, 0.0 }
 0x114   : > { %v1015_v53 = vadd.f32 %v1014_v48, %v1013_v18  ;;  %4644 = vst.msk [vmem:[#allocation2 + $0xb8] sm:$0xff] %vm477_vm3, %v843_v55  ;;  %v998_v54 = vmul.f32 %v843_v55, %v843_v55  ;;  %4642 = vst.msk [vmem:[#allocation2 + $0xa8] sm:$0xff] %vm477_vm3, %v841_v46  ;;  %v960_v36 = vsel %vm477_vm3, %v841_v46, 0.0  ;;  %v964_v56 = vsel %vm477_vm3, %v843_v55, 0.0 }
 0x115   : > { %v961_v57 = vadd.f32 %v960_v36, %v959_v45  ;;  %v996_v58 = vmul.f32 %v841_v46, %v841_v46  ;;  %492 = vst.msk [vmem:[#allocation2 + $0x70] sm:$0xff] %vm477_vm3, %v474_v50  ;;  %v620_v60 = vsel %vm477_vm3, %v474_v50, 0.0  ;;  %v648_v61 = vmul.f32 %v474_v50, %v474_v50 }
 0x116   : > { %v472_v26 = vmax.f32 %v446_v51, 0.0  ;;  %v615_v59 = vadd.f32 %v614_v22, %v613_v38  ;;  %v672_v62 = vadd.f32 %v671_v28, %v670_v47  ;;  %v1020_v7 = vsel %vm477_vm3, %v998_v54, 0.0 }
 0x117   : > { %v963_v8 = vadd.f32 %v962_v49, %v961_v57  ;;  %v1016_v41 = vsel %vm477_vm3, %v996_v58, 0.0  ;;  %v457_v10 = vadd.f32 %v5023_v19, %v5353_v0  ;;  %v449_v15 = vadd.f32 %v5353_v0, %v448_v25 }
 0x118   : > { %v1017_v11 = vadd.f32 %v1016_v41, %v1015_v53  ;;  %490 = vst.msk [vmem:[#allocation2 + $0x60] sm:$0xff] %vm477_vm3, %v472_v26  ;;  %v616_v12 = vsel %vm477_vm3, %v472_v26, 0.0  ;;  %v646_v13 = vmul.f32 %v472_v26, %v472_v26  ;;  %v814_v18 = vadd.f32 %v5562_v20, %v5353_v0 }
 0x119   : > { %v617_v16 = vadd.f32 %v616_v12, %v615_v59  ;;  %v475_v17 = vmax.f32 %v457_v10, 0.0  ;;  %v806_v22 = vadd.f32 %v5353_v0, %v5564_v27  ;;  %v473_v19 = vmax.f32 %v449_v15, 0.0 }
 0x11a   : > { %v1019_v23 = vadd.f32 %v1018_v52, %v1017_v11  ;;  %v673_v37 = vsel %vm477_vm3, %v646_v13, 0.0  ;;  %v965_v24 = vadd.f32 %v964_v56, %v963_v8  ;;  %v677_v30 = vsel %vm477_vm3, %v648_v61, 0.0  ;;  %v592_v13 = vld [vmem:[#allocation3] sm:$0x1] }
 0x11b   : > { %v674_v31 = vadd.f32 %v673_v37, %v672_v62  ;;  %493 = vst.msk [vmem:[#allocation2 + $0x78] sm:$0xff] %vm477_vm3, %v475_v17  ;;  %v622_v25 = vsel %vm477_vm3, %v475_v17, 0.0  ;;  %v846_v43 = vmax.f32 %v814_v18, 0.0  ;;  %491 = vst.msk [vmem:[#allocation2 + $0x68] sm:$0xff] %vm477_vm3, %v473_v19  ;;  %v618_v20 = vsel %vm477_vm3, %v473_v19, 0.0 }
 0x11c   : > { %v647_v63 = vmul.f32 %v473_v19, %v473_v19  ;;  %v844_v28 = vmax.f32 %v806_v22, 0.0  ;;  %v1021_v27 = vadd.f32 %v1020_v7, %v1019_v23  ;;  %v649_v32 = vmul.f32 %v475_v17, %v475_v17  ;;  %v633_v18 = vld [vmem:[#allocation4] sm:$0x1] }
 0x11d   : > { %v619_v34 = vadd.f32 %v618_v20, %v617_v16  ;;  %4647 = vst.msk [vmem:[#allocation2 + $0xd0] sm:$0xff] %vm477_vm3, %v846_v43  ;;  %v817_v35 = vadd.f32 %v5569_v33, %v5353_v0  ;;  %v809_v38 = vadd.f32 %v5353_v0, %v5573_v42  ;;  %v830_v49 = vadd.f32 %v5587_v9, %v5353_v0 }
 0x11e   : > { %v675_v39 = vsel %vm477_vm3, %v647_v63, 0.0  ;;  %4645 = vst.msk [vmem:[#allocation2 + $0xc0] sm:$0xff] %vm477_vm3, %v844_v28  ;;  %v966_v40 = vsel %vm477_vm3, %v844_v28, 0.0  ;;  %v999_v44 = vmul.f32 %v844_v28, %v844_v28  ;;  %v822_v42 = vadd.f32 %v5353_v0, %v5592_v14 }
 0x11f   : > { %v621_v45 = vadd.f32 %v620_v60, %v619_v34  ;;  %v676_v55 = vadd.f32 %v675_v39, %v674_v31  ;;  %v967_v46 = vadd.f32 %v966_v40, %v965_v24  ;;  %v847_v47 = vmax.f32 %v817_v35, 0.0 }
 0x120   : > { %v1022_v48 = vsel %vm477_vm3, %v999_v44, 0.0  ;;  %v845_v33 = vmax.f32 %v809_v38, 0.0  ;;  %v850_v50 = vmax.f32 %v830_v49, 0.0  ;;  %v679_v54 = vsel %vm477_vm3, %v649_v32, 0.0 }
 0x121   : > { %v623_v51 = vadd.f32 %v622_v25, %v621_v45  ;;  %v678_v52 = vadd.f32 %v677_v30, %v676_v55  ;;  %v1023_v53 = vadd.f32 %v1022_v48, %v1021_v27  ;;  %4648 = vst.msk [vmem:[#allocation2 + $0xd8] sm:$0xff] %vm477_vm3, %v847_v47  ;;  %v848_v9 = vmax.f32 %v822_v42, 0.0 }
 0x122   : > { %4646 = vst.msk [vmem:[#allocation2 + $0xc8] sm:$0xff] %vm477_vm3, %v845_v33  ;;  %4651 = vst.msk [vmem:[#allocation2 + $0xf0] sm:$0xff] %vm477_vm3, %v850_v50  ;;  %v833_v36 = vadd.f32 %v5597_v21, %v5353_v0  ;;  %v825_v56 = vadd.f32 %v5353_v0, %v5602_v29  ;;  %v982_v58 = vrot.slane %v967_v46, 4 }
 0x123   : > { %v624_v57 = vrot.slane %v623_v51, 4  ;;  %v680_v14 = vadd.f32 %v679_v54, %v678_v52  ;;  %4649 = vst.msk [vmem:[#allocation2 + $0xe0] sm:$0xff] %vm477_vm3, %v848_v9  ;;  %v1038_v62 = vrot.slane %v1023_v53, 4 }
 0x124   : > { %v851_v60 = vmax.f32 %v833_v36, 0.0  ;;  %v849_v61 = vmax.f32 %v825_v56, 0.0  ;;  %v983_v21 = vadd.f32 %v982_v58, %v967_v46 }
 0x125   : > { %v625_v26 = vadd.f32 %v624_v57, %v623_v51  ;;  %v681_v59 = vrot.slane %v680_v14, 4  ;;  %v1039_v0 = vadd.f32 %v1038_v62, %v1023_v53 }
 0x126   : > { %4652 = vst.msk [vmem:[#allocation2 + $0xf8] sm:$0xff] %vm477_vm3, %v851_v60  ;;  %4650 = vst.msk [vmem:[#allocation2 + $0xe8] sm:$0xff] %vm477_vm3, %v849_v61  ;;  %v984_v12 = vrot.slane %v983_v21, 2 }
 0x127   : > { %v626_v7 = vrot.slane %v625_v26, 2  ;;  %v682_v8 = vadd.f32 %v681_v59, %v680_v14  ;;  %v1040_v17 = vrot.slane %v1039_v0, 2 }
 0x128   : > { %v985_v37 = vadd.f32 %v984_v12, %v983_v21 }
 0x129   : > { %v627_v41 = vadd.f32 %v626_v7, %v625_v26  ;;  %v683_v10 = vrot.slane %v682_v8, 2  ;;  %v1041_v24 = vadd.f32 %v1040_v17, %v1039_v0 }
 0x12a   : > { %v986_v30 = vrot.slane %v985_v37, 1 }
 0x12b   : > { %v628_v29 = vrot.slane %v627_v41, 1  ;;  %v684_v11 = vadd.f32 %v683_v10, %v682_v8  ;;  %v1042_v31 = vrot.slane %v1041_v24, 1 }
 0x12c   : > { %v987_v25 = vadd.f32 %v986_v30, %v985_v37 }
 0x12d   : > { %v629_v15 = vadd.f32 %v628_v29, %v627_v41  ;;  %v685_v16 = vrot.slane %v684_v11, 1  ;;  %v1043_v63 = vadd.f32 %v1042_v31, %v1041_v24 }
 0x12f   : > { %v630_v22 = vadd.f32 %v629_v15, %v592_v13  ;;  %v686_v23 = vadd.f32 %v685_v16, %v684_v11 }
 0x131   : > { %632 = vst.msk [vmem:[#allocation3] sm:$0x1] %vm631_vm4, %v630_v22  ;;  %v687_v19 = vadd.f32 %v686_v23, %v633_v18 }
 0x133   : > { %688 = vst.msk [vmem:[#allocation4] sm:$0x1] %vm631_vm4, %v687_v19 }
 0x138   : > { %v950_v43 = vld [vmem:[#allocation3] sm:$0x1] }
 0x139   : > { %v988_v20 = vadd.f32 %v987_v25, %v950_v43 }
 0x13a   : > { %v990_v28 = vld [vmem:[#allocation4] sm:$0x1] }
 0x13b   : > { %989 = vst.msk [vmem:[#allocation3] sm:$0x1] %vm631_vm4, %v988_v20  ;;  %v1044_v27 = vadd.f32 %v1043_v63, %v990_v28 }
 0x13d   : > { %1045 = vst.msk [vmem:[#allocation4] sm:$0x1] %vm631_vm4, %v1044_v27 }
 0x13e PF: > { %p4703_p6 = scmp.ne.s32.totalorder %s5276_s18, 1 }
 0x13f   : > { %v1635_v32 = vld [vmem:[%s6217_s2] sm:$0xff] (!%p4703_p6)  ;;  %v1636_v34 = vld [vmem:[%s6217_s2 + $0x8] sm:$0xff] (!%p4703_p6)  ;;  %v5291_v35 = vmov (!%p4703_p6), 0.0|0.0   ;;  %vm5292_vm5 = vmmov (!%p4703_p6), 0   ;;  %v5293_v39 = vmov (!%p4703_p6), 0.0   ;;  %v1732_v48 = vlaneseq (!%p4703_p6)  ;;  %v1718_v56 = vld [vmem:[#allocation2 + $0x10] sm:$0xff] (!%p4703_p6) }
 0x140   : > { %1623 = sbr.rel (%p4703_p6) target bundleno = 744 (0x2e8), region = 60  ;;  %5164 = vmatprep.subr.bf16.mxu0 (!%p4703_p6), %v5291_v35  ;;  %v5165_v38 = vpack.c.bf16 (!%p4703_p6), %v1636_v34, %v1635_v32  ;;  %5048 = vmatprep.mubr.msk.f32.mxu0 (!%p4703_p6), %vm5292_vm5, %v5293_v39  ;;  %v1716_v52 = vld [vmem:[#allocation2] sm:$0xff] (!%p4703_p6)  ;;  %v1717_v53 = vld [vmem:[#allocation2 + $0x8] sm:$0xff] (!%p4703_p6)  ;;  %vm1637_vm6 = vcmask (!%p4703_p6), 130048   ;;  %v4723_v26 = vld [vmem:[#allocation2 + $0x90] sm:$0xff] (!%p4703_p6)  ;;  %vm2145_vm7 = vcmask (!%p4703_p6), 64512  }
 0x141   : > { %v5675_v33 = vshrl.u32 (!%p4703_p6), %v1732_v48, 7  ;;  %v4721_v54 = vld [vmem:[#allocation2 + $0x80] sm:$0xff] (!%p4703_p6)  ;;  %v4722_v57 = vld [vmem:[#allocation2 + $0x88] sm:$0xff] (!%p4703_p6)  ;;  %v4724_v21 = vld [vmem:[#allocation2 + $0x98] sm:$0xff] (!%p4703_p6)  ;;  %s5294_s29 = smov (!%p4703_p6), 16   ;;  %vm2184_vm8 = vcmask (!%p4703_p6), 57344  }
 0x142   : > { %v1624_v40 = vld [vmem:[#allocation3] sm:$0x1] (!%p4703_p6)  ;;  %5166 = vmatpush3.bf16.msra.mxu0 (!%p4703_p6), %v5165_v38  ;;  %5168 = vmatprep.subr.bf16.mxu1 (!%p4703_p6), %v5165_v38  ;;  %v1721_v10 = vld [vmem:[#allocation2 + $0x28] sm:$0xff] (!%p4703_p6)  ;;  %v1722_v29 = vld [vmem:[#allocation2 + $0x30] sm:$0xff] (!%p4703_p6)  ;;  %vm2029_vm9 = vcmask (!%p4703_p6), 195712  }
 0x143   : > { %v1625_v49 = vmul.f32 (!%p4703_p6), 0.005, %v1624_v40  ;;  %5170 = vmatpush3.bf16.msra.mxu1 (!%p4703_p6), %v5165_v38  ;;  %5172 = vmatprep.subr.bf16.mxu0 (!%p4703_p6), %v5165_v38  ;;  %v1734_v50 = vsub.s32 (!%p4703_p6), 0, %v5675_v33  ;;  %v1720_v62 = vld [vmem:[#allocation2 + $0x20] sm:$0xff] (!%p4703_p6)  ;;  %v4726_v15 = vld [vmem:[#allocation2 + $0xa8] sm:$0xff] (!%p4703_p6)  ;;  %v1723_v17 = vld [vmem:[#allocation2 + $0x38] sm:$0xff] (!%p4703_p6) }
 0x144   : > { %v1626_v44 = vld [vmem:[#allocation4] sm:$0x1] (!%p4703_p6)  ;;  %v4727_v18 = vld [vmem:[#allocation2 + $0xb0] sm:$0xff] (!%p4703_p6)  ;;  %v4728_v24 = vld [vmem:[#allocation2 + $0xb8] sm:$0xff] (!%p4703_p6) }
 0x145   : > { %v1627_v45 = vmul.f32 (!%p4703_p6), 0.005, %v1626_v44  ;;  %v1628_v55 = vmul.f32 (!%p4703_p6), %v1625_v49, %v1625_v49  ;;  %v4725_v0 = vld [vmem:[#allocation2 + $0xa0] sm:$0xff] (!%p4703_p6)  ;;  %v1725_v31 = vld [vmem:[#allocation2 + $0x48] sm:$0xff] (!%p4703_p6)  ;;  %v1726_v43 = vld [vmem:[#allocation2 + $0x50] sm:$0xff] (!%p4703_p6) }
 0x146   : > { %v1724_v22 = vld [vmem:[#allocation2 + $0x40] sm:$0xff] (!%p4703_p6)  ;;  %v4730_v27 = vld [vmem:[#allocation2 + $0xc8] sm:$0xff] (!%p4703_p6)  ;;  %v1727_v34 = vld [vmem:[#allocation2 + $0x58] sm:$0xff] (!%p4703_p6) }
 0x147   : > { %v1629_v46 = vsub.f32 %v1627_v45, %v1628_v55  ;;  %v4729_v25 = vld [vmem:[#allocation2 + $0xc0] sm:$0xff]  ;;  %v4731_v35 = vld [vmem:[#allocation2 + $0xd0] sm:$0xff]  ;;  %v1729_v55 = vld [vmem:[#allocation2 + $0x68] sm:$0xff] }
 0x149   : > { %v1630_v47 = vadd.f32 1e-05, %v1629_v46  ;;  %v4733_v46 = vld [vmem:[#allocation2 + $0xe0] sm:$0xff] }
 0x14b   : > { %5242 = vrsqrt.f32 %v1630_v47  ;;  %v1730_v47 = vld [vmem:[#allocation2 + $0x70] sm:$0xff] }
 0x155   : > { %v5243_v42 = vpop.eup %5242 }
 0x156   : > { %v1632_v51 = vmul.f32 %v5243_v42, %v5358_v1  ;;  %v1719_v1 = vld [vmem:[#allocation2 + $0x18] sm:$0xff] }
 0x158   : > { %v1633_v9 = vmul.f32 %v1632_v51, %v1625_v49  ;;  %v5681_v36 = vrot.slane %v1632_v51, %v1734_v50  ;;  %v4732_v49 = vld [vmem:[#allocation2 + $0xd8] sm:$0xff] }
 0x15a   : > { %v1634_v14 = vsub.f32 %v5363_v2, %v1633_v9  ;;  %v1736_v58 = vmul.f32 %v5681_v36, %v1716_v52  ;;  %v1737_v60 = vmul.f32 %v5681_v36, %v1717_v53  ;;  %v2260_v61 = vmul.f32 %v4721_v54, %v5681_v36  ;;  %v4734_v52 = vld [vmem:[#allocation2 + $0xe8] sm:$0xff]  ;;  %v1731_v54 = vld [vmem:[#allocation2 + $0x78] sm:$0xff]  ;;  %v4735_v9 = vld [vmem:[#allocation2 + $0xf0] sm:$0xff] }
 0x15b   : > { %v1738_v59 = vmul.f32 %v5681_v36, %v1718_v56  ;;  %v2261_v7 = vmul.f32 %v4722_v57, %v5681_v36  ;;  %v1739_v2 = vmul.f32 %v5681_v36, %v1719_v1  ;;  %v2262_v8 = vmul.f32 %v4723_v26, %v5681_v36 }
 0x15c   : > { %5049 = vmatmul.mubr.msk.f32.vlgmr.msra.gmra.mrb[0].mxu0 %vm1637_vm6, %v1634_v14  ;;  %5055 = vmatprep.mubr.msk.f32.mxu1 %vm1637_vm6, %v1736_v58  ;;  %v1740_v41 = vmul.f32 %v5681_v36, %v1720_v62  ;;  %v2263_v11 = vmul.f32 %v4724_v21, %v5681_v36  ;;  %v1741_v12 = vmul.f32 %v5681_v36, %v1721_v10  ;;  %v4736_v58 = vld [vmem:[#allocation2 + $0xf8] sm:$0xff] }
 0x15d   : > { %5174 = vmatpush3.bf16.msra.mxu0 %v5165_v38  ;;  %5056 = vmatmul.mubr.msk.f32.vlgmr.msra.gmra.mrb[0].mxu1 %vm1637_vm6, %v1737_v60  ;;  %v2264_v13 = vmul.f32 %v4725_v0, %v5681_v36  ;;  %v1742_v16 = vmul.f32 %v5681_v36, %v1722_v29  ;;  %v2265_v23 = vmul.f32 %v4726_v15, %v5681_v36  ;;  %v1728_v38 = vld [vmem:[#allocation2 + $0x60] sm:$0xff] }
 0x15e   : > { %5083 = vmatprep.mubr.msk.f32.mxu0 %vm1637_vm6, %v2260_v61  ;;  %5058 = vmatprep.mubr.msk.f32.mxu1 %vm1637_vm6, %v1738_v59  ;;  %v1743_v37 = vmul.f32 %v5681_v36, %v1723_v17  ;;  %v2266_v19 = vmul.f32 %v4727_v18, %v5681_v36  ;;  %v1744_v30 = vmul.f32 %v5681_v36, %v1724_v22 }
 0x15f   : > { %v2267_v20 = vmul.f32 %v4728_v24, %v5681_v36  ;;  %v1745_v63 = vmul.f32 %v5681_v36, %v1725_v31  ;;  %v2268_v28 = vmul.f32 %v4729_v25, %v5681_v36  ;;  %v1746_v32 = vmul.f32 %v5681_v36, %v1726_v43 }
 0x160   : > { %5084 = vmatmul.mubr.msk.f32.vlgmr.msra.gmra.mrb[2].mxu0 %vm1637_vm6, %v2261_v7  ;;  %v2269_v39 = vmul.f32 %v4730_v27, %v5681_v36  ;;  %v1747_v40 = vmul.f32 %v5681_v36, %v1727_v34  ;;  %v2270_v44 = vmul.f32 %v4731_v35, %v5681_v36  ;;  %v1748_v45 = vmul.f32 %v5681_v36, %v1728_v38 }
 0x161   : > { %5059 = vmatmul.mubr.msk.f32.gmra.mrb[2].mxu1 %vm1637_vm6, %v1739_v2  ;;  %5086 = vmatprep.mubr.msk.f32.mxu0 %vm1637_vm6, %v2262_v8  ;;  %v2271_v48 = vmul.f32 %v4732_v49, %v5681_v36  ;;  %v1749_v42 = vmul.f32 %v5681_v36, %v1729_v55  ;;  %v2272_v51 = vmul.f32 %v4733_v46, %v5681_v36 }
 0x162   : > { %5061 = vmatprep.mubr.msk.f32.mxu1 %vm1637_vm6, %v1740_v41  ;;  %v1750_v53 = vmul.f32 %v5681_v36, %v1730_v47  ;;  %v2273_v56 = vmul.f32 %v4734_v52, %v5681_v36  ;;  %v1751_v57 = vmul.f32 %v5681_v36, %v1731_v54  ;;  %v2274_v14 = vmul.f32 %v4735_v9, %v5681_v36 }
 0x163   : > { %v2275_v60 = vmul.f32 %v4736_v58, %v5681_v36 }
 0x164   : > { %5087 = vmatmul.mubr.msk.f32.gmra.mrb[4].mxu0 %vm1637_vm6, %v2263_v11 }
 0x165   : > { %5062 = vmatmul.mubr.msk.f32.gmra.mrb[4].mxu1 %vm1637_vm6, %v1741_v12  ;;  %5089 = vmatprep.mubr.msk.f32.mxu0 %vm1637_vm6, %v2264_v13 }
 0x166   : > { %5064 = vmatprep.mubr.msk.f32.mxu1 %vm1637_vm6, %v1742_v16 }
 0x168   : > { %5090 = vmatmul.mubr.msk.f32.gmra.mrb[6].mxu0 %vm1637_vm6, %v2265_v23 }
 0x169   : > { %5065 = vmatmul.mubr.msk.f32.gmra.mrb[6].mxu1 %vm1637_vm6, %v1743_v37  ;;  %5092 = vmatprep.mubr.msk.f32.mxu0 %vm1637_vm6, %v2266_v19 }
 0x16a   : > { %5067 = vmatprep.mubr.msk.f32.mxu1 %vm1637_vm6, %v1744_v30 }
 0x16c   : > { %5093 = vmatmul.mubr.msk.f32.gmra.mrb[8].mxu0 %vm1637_vm6, %v2267_v20 }
 0x16d   : > { %5068 = vmatmul.mubr.msk.f32.gmra.mrb[8].mxu1 %vm1637_vm6, %v1745_v63  ;;  %5095 = vmatprep.mubr.msk.f32.mxu0 %vm1637_vm6, %v2268_v28 }
 0x16e   : > { %5070 = vmatprep.mubr.msk.f32.mxu1 %vm1637_vm6, %v1746_v32 }
 0x170   : > { %5096 = vmatmul.mubr.msk.f32.gmra.mrb[10].mxu0 %vm1637_vm6, %v2269_v39 }
 0x171   : > { %5071 = vmatmul.mubr.msk.f32.gmra.mrb[10].mxu1 %vm1637_vm6, %v1747_v40  ;;  %5098 = vmatprep.mubr.msk.f32.mxu0 %vm1637_vm6, %v2270_v44 }
 0x172   : > { %5073 = vmatprep.mubr.msk.f32.mxu1 %vm1637_vm6, %v1748_v45 }
 0x174   : > { %5099 = vmatmul.mubr.msk.f32.gmra.mrb[12].mxu0 %vm1637_vm6, %v2271_v48 }
 0x175   : > { %5074 = vmatmul.mubr.msk.f32.gmra.mrb[12].mxu1 %vm1637_vm6, %v1749_v42  ;;  %5101 = vmatprep.mubr.msk.f32.mxu0 %vm1637_vm6, %v2272_v51 }
 0x176   : > { %5076 = vmatprep.mubr.msk.f32.mxu1 %vm1637_vm6, %v1750_v53 }
 0x178   : > { %5102 = vmatmul.mubr.msk.f32.gmra.mrb[14].mxu0 %vm1637_vm6, %v2273_v56 }
 0x179   : > { %5077 = vmatmul.mubr.msk.f32.gmra.mrb[14].mxu1 %vm1637_vm6, %v1751_v57  ;;  %5104 = vmatprep.mubr.msk.f32.mxu0 %vm1637_vm6, %v2274_v14 }
 0x17c   : > { %5105 = vmatmul.mubr.msk.f32.gmra.mrb[16].mxu0 %vm1637_vm6, %v2275_v60 }
 0x22f   : > { %v1707_v61 = vpop.f32.mrb[0].mxu0 }
 0x230   : > { %v1708_v1 = vadd.f32 %v1707_v61, %v5368_v3  ;;  %v5050_v26 = vpop.f32.mrb[1].mxu0  ;;  %v5057_v59 = vpop.f32.mrb[0].mxu1 }
 0x231   : > { %v1870_v62 = vpop.f32.mrb[1].mxu1 }
 0x232   : > { %v5752_v7 = vrot.slane %v1708_v1, %v1734_v50 }
 0x233   : > { %v5085_v2 = vpop.f32.mrb[2].mxu0 }
 0x234   : > { %v1876_v8 = vadd.f32 %v5057_v59, %v5752_v7  ;;  %v1871_v36 = vadd.f32 %v1870_v62, %v5752_v7  ;;  %v2396_v21 = vadd.f32 %v5085_v2, %v5752_v7  ;;  %v5060_v41 = vpop.f32.mrb[2].mxu1  ;;  %v2390_v10 = vpop.f32.mrb[3].mxu0 }
 0x235   : > { %v1886_v0 = vadd.f32 %v5060_v41, %v5752_v7  ;;  %v2391_v3 = vadd.f32 %v2390_v10, %v5752_v7  ;;  %v1880_v29 = vpop.f32.mrb[3].mxu1 }
 0x236   : > { %v1950_v11 = vmax.f32 %v1876_v8, 0.0  ;;  %v1949_v12 = vmax.f32 %v1871_v36, 0.0  ;;  %v2470_v33 = vmax.f32 %v2396_v21, 0.0  ;;  %v1881_v50 = vadd.f32 %v1880_v29, %v5752_v7 }
 0x237   : > { %v1952_v13 = vmax.f32 %v1886_v0, 0.0  ;;  %v2469_v15 = vmax.f32 %v2391_v3, 0.0  ;;  %v5088_v16 = vpop.f32.mrb[4].mxu0 }
 0x238   : > { %v2147_v17 = vsel %vm2145_vm7, %v1950_v11, 0.0  ;;  %v2188_v18 = vmul.f32 %v1950_v11, %v1950_v11  ;;  %v2146_v22 = vsel %vm2145_vm7, %v1949_v12, 0.0  ;;  %v2187_v23 = vmul.f32 %v1949_v12, %v1949_v12  ;;  %v5063_v37 = vpop.f32.mrb[4].mxu1  ;;  %1981 = vrot.lane.b32.xlu0 %v1949_v12, %s5294_s29  ;;  %2503 = vrot.lane.b32.xlu1 %v2470_v33, %s5294_s29  ;;  %v2400_v19 = vpop.f32.mrb[5].mxu0 }
 0x239   : > { %v2148_v24 = vadd.f32 %v2147_v17, %v2146_v22  ;;  %v2648_v30 = vsel %vm2145_vm7, %v2470_v33, 0.0  ;;  %v2688_v31 = vmul.f32 %v2470_v33, %v2470_v33  ;;  %v1890_v25 = vpop.f32.mrb[5].mxu1  ;;  %v2647_v63 = vsel %vm2145_vm7, %v2469_v15, 0.0 }
 0x23a   : > { %v2204_v43 = vsel %vm2145_vm7, %v2188_v18, 0.0  ;;  %v2203_v20 = vsel %vm2145_vm7, %v2187_v23, 0.0  ;;  %v2649_v32 = vadd.f32 %v2648_v30, %v2647_v63  ;;  %v2687_v34 = vmul.f32 %v2469_v15, %v2469_v15 }
 0x23b   : > { %v2205_v28 = vadd.f32 %v2204_v43, %v2203_v20  ;;  %v2704_v27 = vsel %vm2145_vm7, %v2688_v31, 0.0  ;;  %v5091_v35 = vpop.f32.mrb[6].mxu0  ;;  %v2190_v38 = vmul.f32 %v1952_v13, %v1952_v13  ;;  %v1951_v39 = vmax.f32 %v1881_v50, 0.0 }
 0x23c   : > { %v2406_v40 = vadd.f32 %v5088_v16, %v5752_v7  ;;  %v1896_v44 = vadd.f32 %v5063_v37, %v5752_v7  ;;  %v5066_v49 = vpop.f32.mrb[6].mxu1  ;;  %1983 = vrot.lane.b32.xlu0 %v1950_v11, %s5294_s29  ;;  %1987 = vrot.lane.b32.xlu1 %v1952_v13, %s5294_s29  ;;  %v2410_v45 = vpop.f32.mrb[7].mxu0  ;;  %v2703_v55 = vsel %vm2145_vm7, %v2687_v34, 0.0  ;;  %v2401_v46 = vadd.f32 %v2400_v19, %v5752_v7 }
 0x23d   : > { %v1891_v47 = vadd.f32 %v1890_v25, %v5752_v7  ;;  %v2416_v48 = vadd.f32 %v5091_v35, %v5752_v7  ;;  %v1900_v42 = vpop.f32.mrb[7].mxu1  ;;  %v2705_v51 = vadd.f32 %v2704_v27, %v2703_v55  ;;  %v2149_v52 = vsel %vm2145_vm7, %v1951_v39, 0.0 }
 0x23e   : > { %v2189_v53 = vmul.f32 %v1951_v39, %v1951_v39  ;;  %v2472_v54 = vmax.f32 %v2406_v40, 0.0  ;;  %v2150_v9 = vadd.f32 %v2149_v52, %v2148_v24  ;;  %v1954_v56 = vmax.f32 %v1896_v44, 0.0 }
 0x23f   : > { %v2471_v57 = vmax.f32 %v2401_v46, 0.0  ;;  %v1953_v14 = vmax.f32 %v1891_v47, 0.0  ;;  %v5094_v58 = vpop.f32.mrb[8].mxu0  ;;  %v2151_v60 = vsel %vm2145_vm7, %v1952_v13, 0.0  ;;  %v2208_v61 = vsel %vm2145_vm7, %v2190_v38, 0.0 }
 0x240   : > { %v2206_v1 = vsel %vm2145_vm7, %v2189_v53, 0.0  ;;  %v2690_v26 = vmul.f32 %v2472_v54, %v2472_v54  ;;  %v5069_v59 = vpop.f32.mrb[8].mxu1  ;;  %1985 = vrot.lane.b32.xlu1 %v1951_v39, %s5294_s29  ;;  %v5782_v62 = vpop.f32.mrb[9].mxu0  ;;  %2501 = vrot.lane.b32.xlu0 %v2469_v15, %s5294_s29  ;;  %v2652_v8 = vsel %vm2145_vm7, %v2472_v54, 0.0  ;;  %v2192_v36 = vmul.f32 %v1954_v56, %v1954_v56 }
 0x241   : > { %v2207_v2 = vadd.f32 %v2206_v1, %v2205_v28  ;;  %v2650_v21 = vsel %vm2145_vm7, %v2471_v57, 0.0  ;;  %v5787_v41 = vpop.f32.mrb[9].mxu1  ;;  %v2689_v0 = vmul.f32 %v2471_v57, %v2471_v57  ;;  %v2152_v3 = vadd.f32 %v2151_v60, %v2150_v9 }
 0x242   : > { %v2651_v10 = vadd.f32 %v2650_v21, %v2649_v32  ;;  %v2474_v29 = vmax.f32 %v2416_v48, 0.0  ;;  %v2155_v11 = vsel %vm2145_vm7, %v1954_v56, 0.0  ;;  %v2153_v12 = vsel %vm2145_vm7, %v1953_v14, 0.0 }
 0x243   : > { %v2191_v33 = vmul.f32 %v1953_v14, %v1953_v14  ;;  %v2209_v50 = vadd.f32 %v2208_v61, %v2207_v2  ;;  %v5791_v13 = vpop.f32.mrb[10].mxu0  ;;  %v2708_v15 = vsel %vm2145_vm7, %v2690_v26, 0.0  ;;  %v2212_v16 = vsel %vm2145_vm7, %v2192_v36, 0.0 }
 0x244   : > { %v2706_v17 = vsel %vm2145_vm7, %v2689_v0, 0.0  ;;  %v2154_v18 = vadd.f32 %v2153_v12, %v2152_v3  ;;  %v5796_v22 = vpop.f32.mrb[10].mxu1  ;;  %2507 = vrot.lane.b32.xlu1 %v2472_v54, %s5294_s29  ;;  %v2430_v23 = vpop.f32.mrb[11].mxu0  ;;  %2505 = vrot.lane.b32.xlu0 %v2471_v57, %s5294_s29  ;;  %v1906_v24 = vadd.f32 %v5066_v49, %v5752_v7  ;;  %v2411_v30 = vadd.f32 %v2410_v45, %v5752_v7 }
 0x245   : > { %v2707_v37 = vadd.f32 %v2706_v17, %v2705_v51  ;;  %v2210_v19 = vsel %vm2145_vm7, %v2191_v33, 0.0  ;;  %v1920_v31 = vpop.f32.mrb[11].mxu1  ;;  %v2692_v43 = vmul.f32 %v2474_v29, %v2474_v29  ;;  %v2653_v20 = vadd.f32 %v2652_v8, %v2651_v10 }
 0x246   : > { %v2211_v25 = vadd.f32 %v2210_v19, %v2209_v50  ;;  %v1901_v63 = vadd.f32 %v1900_v42, %v5752_v7  ;;  %v1956_v28 = vmax.f32 %v1906_v24, 0.0  ;;  %v2473_v27 = vmax.f32 %v2411_v30, 0.0 }
 0x247   : > { %v2709_v32 = vadd.f32 %v2708_v15, %v2707_v37  ;;  %v2156_v34 = vadd.f32 %v2155_v11, %v2154_v18  ;;  %v5100_v35 = vpop.f32.mrb[12].mxu0  ;;  %v2426_v40 = vadd.f32 %v5094_v58, %v5752_v7  ;;  %v1916_v44 = vadd.f32 %v5069_v59, %v5752_v7 }
 0x248   : > { %v1955_v38 = vmax.f32 %v1901_v63, 0.0  ;;  %v2213_v39 = vadd.f32 %v2212_v16, %v2211_v25  ;;  %v5806_v49 = vpop.f32.mrb[12].mxu1  ;;  %1991 = vrot.lane.b32.xlu1 %v1954_v56, %s5294_s29  ;;  %v5809_v45 = vpop.f32.mrb[13].mxu0  ;;  %1989 = vrot.lane.b32.xlu0 %v1953_v14, %s5294_s29  ;;  %v2194_v55 = vmul.f32 %v1956_v28, %v1956_v28  ;;  %v2654_v46 = vsel %vm2145_vm7, %v2473_v27, 0.0 }
 0x249   : > { %v2691_v47 = vmul.f32 %v2473_v27, %v2473_v27  ;;  %v5813_v48 = vpop.f32.mrb[13].mxu1  ;;  %v2655_v42 = vadd.f32 %v2654_v46, %v2653_v20  ;;  %v2476_v53 = vmax.f32 %v2426_v40, 0.0  ;;  %v2656_v54 = vsel %vm2145_vm7, %v2474_v29, 0.0 }
 0x24a   : > { %v2157_v51 = vsel %vm2145_vm7, %v1955_v38, 0.0  ;;  %v2193_v52 = vmul.f32 %v1955_v38, %v1955_v38  ;;  %v5818_v57 = vmax.f32 %v1916_v44, 0.0  ;;  %v2712_v14 = vsel %vm2145_vm7, %v2692_v43, 0.0 }
 0x24b   : > { %v2710_v9 = vsel %vm2145_vm7, %v2691_v47, 0.0  ;;  %v2158_v56 = vadd.f32 %v2157_v51, %v2156_v34  ;;  %v5820_v58 = vpop.f32.mrb[14].mxu0  ;;  %v2159_v60 = vsel %vm2145_vm7, %v1956_v28, 0.0  ;;  %v2216_v2 = vsel %vm2145_vm7, %v2194_v55, 0.0 }
 0x24c   : > { %v2711_v61 = vadd.f32 %v2710_v9, %v2709_v32  ;;  %v2214_v1 = vsel %vm2145_vm7, %v2193_v52, 0.0  ;;  %v5825_v26 = vpop.f32.mrb[14].mxu1  ;;  %2511 = vrot.lane.b32.xlu1 %v2474_v29, %s5294_s29  ;;  %v5828_v59 = vpop.f32.mrb[15].mxu0  ;;  %2509 = vrot.lane.b32.xlu0 %v2473_v27, %s5294_s29  ;;  %v2660_v36 = vsel %vm2145_vm7, %v2476_v53, 0.0  ;;  %v2421_v21 = vadd.f32 %v5782_v62, %v5752_v7 }
 0x24d   : > { %v2215_v8 = vadd.f32 %v2214_v1, %v2213_v39  ;;  %v5835_v10 = vpop.f32.mrb[15].mxu1  ;;  %v2694_v0 = vmul.f32 %v2476_v53, %v2476_v53  ;;  %v2657_v3 = vadd.f32 %v2656_v54, %v2655_v42  ;;  %v1911_v29 = vadd.f32 %v5787_v41, %v5752_v7 }
 0x24e   : > { %v2713_v11 = vadd.f32 %v2712_v14, %v2711_v61  ;;  %v2196_v12 = vmul.f32 %v5818_v57, %v5818_v57  ;;  %v2475_v33 = vmax.f32 %v2421_v21, 0.0  ;;  %v2160_v50 = vadd.f32 %v2159_v60, %v2158_v56 }
 0x24f   : > { %v2217_v15 = vadd.f32 %v2216_v2, %v2215_v8  ;;  %v5841_v16 = vpop.f32.mrb[16].mxu0  ;;  %v1957_v17 = vmax.f32 %v1911_v29, 0.0  ;;  %v2436_v62 = vadd.f32 %v5791_v13, %v5752_v7  ;;  %v1926_v18 = vadd.f32 %v5796_v22, %v5752_v7 }
 0x250   : > { %v2431_v37 = vadd.f32 %v2430_v23, %v5752_v7  ;;  %1995 = vrot.lane.b32.xlu1 %v1956_v28, %s5294_s29  ;;  %v5849_v41 = vpop.f32.mrb[17].mxu0  ;;  %1993 = vrot.lane.b32.xlu0 %v1955_v38, %s5294_s29  ;;  %v2658_v19 = vsel %vm2145_vm7, %v2475_v33, 0.0  ;;  %v2693_v24 = vmul.f32 %v2475_v33, %v2475_v33  ;;  %v1921_v30 = vadd.f32 %v1920_v31, %v5752_v7 }
 0x251   : > { %v5855_v25 = vadd.f32 %v5100_v35, %v5752_v7  ;;  %v2163_v13 = vsel %vm2145_vm7, %v5818_v57, 0.0  ;;  %v2659_v22 = vadd.f32 %v2658_v19, %v2657_v3  ;;  %v2161_v23 = vsel %vm2145_vm7, %v1957_v17, 0.0 }
 0x252   : > { %v2195_v43 = vmul.f32 %v1957_v17, %v1957_v17  ;;  %v2714_v20 = vsel %vm2145_vm7, %v2693_v24, 0.0  ;;  %v2162_v63 = vadd.f32 %v2161_v23, %v2160_v50  ;;  %v1960_v28 = vmax.f32 %v1926_v18, 0.0 }
 0x253   : > { %v2477_v27 = vmax.f32 %v2431_v37, 0.0  ;;  %v2715_v32 = vadd.f32 %v2714_v20, %v2713_v11  ;;  %v2661_v38 = vadd.f32 %v2660_v36, %v2659_v22  ;;  %v1959_v31 = vmax.f32 %v1921_v30, 0.0 }
 0x254   : > { %v2218_v34 = vsel %vm2145_vm7, %v2195_v43, 0.0  ;;  %2515 = vrot.lane.b32.xlu1 %v2476_v53, %s5294_s29  ;;  %2513 = vrot.lane.b32.xlu0 %v2475_v33, %s5294_s29  ;;  %v2716_v35 = vsel %vm2145_vm7, %v2694_v0, 0.0  ;;  %v2220_v39 = vsel %vm2145_vm7, %v2196_v12, 0.0  ;;  %v2164_v42 = vadd.f32 %v2163_v13, %v2162_v63 }
 0x255   : > { %v2219_v40 = vadd.f32 %v2218_v34, %v2217_v15  ;;  %v2662_v44 = vsel %vm2145_vm7, %v2477_v27, 0.0  ;;  %v2695_v46 = vmul.f32 %v2477_v27, %v2477_v27  ;;  %v2717_v47 = vadd.f32 %v2716_v35, %v2715_v32 }
 0x256   : > { %v5867_v55 = vadd.f32 %v2662_v44, %v2661_v38  ;;  %v2198_v51 = vmul.f32 %v1960_v28, %v1960_v28  ;;  %v2165_v52 = vsel %vm2145_vm7, %v1959_v31, 0.0  ;;  %v2197_v54 = vmul.f32 %v1959_v31, %v1959_v31 }
 0x257   : > { %v2221_v9 = vadd.f32 %v2220_v39, %v2219_v40  ;;  %v2167_v53 = vsel %vm2145_vm7, %v1960_v28, 0.0  ;;  %v2718_v56 = vsel %vm2145_vm7, %v2695_v46, 0.0  ;;  %v2166_v14 = vadd.f32 %v2165_v52, %v2164_v42 }
 0x258   : > { %1999 = vrot.lane.b32.xlu1 %v5818_v57, %s5294_s29  ;;  %1997 = vrot.lane.b32.xlu0 %v1957_v17, %s5294_s29  ;;  %v2719_v60 = vadd.f32 %v2718_v56, %v2717_v47  ;;  %v2222_v61 = vsel %vm2145_vm7, %v2197_v54, 0.0  ;;  %v1936_v1 = vadd.f32 %v5806_v49, %v5752_v7  ;;  %v2441_v2 = vadd.f32 %v5809_v45, %v5752_v7 }
 0x259   : > { %v2478_v8 = vmax.f32 %v2436_v62, 0.0  ;;  %v2223_v36 = vadd.f32 %v2222_v61, %v2221_v9  ;;  %v1931_v21 = vadd.f32 %v5813_v48, %v5752_v7  ;;  %v2168_v0 = vadd.f32 %v2167_v53, %v2166_v14  ;;  %v2144_v61 = vld [vmem:[#allocation5] sm:$0x1] }
 0x25a   : > { %v2224_v3 = vsel %vm2145_vm7, %v2198_v51, 0.0  ;;  %v1962_v57 = vmax.f32 %v1936_v1, 0.0  ;;  %v2456_v11 = vadd.f32 %v5820_v58, %v5752_v7  ;;  %v1946_v49 = vadd.f32 %v5825_v26, %v5752_v7 }
 0x25b   : > { %v1961_v29 = vmax.f32 %v1931_v21, 0.0  ;;  %v2225_v12 = vadd.f32 %v2224_v3, %v2223_v36  ;;  %v2451_v15 = vadd.f32 %v5828_v59, %v5752_v7  ;;  %v2480_v17 = vmax.f32 %v5855_v25, 0.0 }
 0x25c   : > { %2519 = vrot.lane.b32.xlu1 %v2478_v8, %s5294_s29  ;;  %2517 = vrot.lane.b32.xlu0 %v2477_v27, %s5294_s29  ;;  %v2200_v45 = vmul.f32 %v1962_v57, %v1962_v57  ;;  %v2171_v26 = vsel %vm2145_vm7, %v1962_v57, 0.0  ;;  %v1964_v18 = vmax.f32 %v1946_v49, 0.0  ;;  %v1941_v37 = vadd.f32 %v5835_v10, %v5752_v7 }
 0x25d   : > { %v2169_v33 = vsel %vm2145_vm7, %v1961_v29, 0.0  ;;  %v2199_v48 = vmul.f32 %v1961_v29, %v1961_v29  ;;  %v2479_v24 = vmax.f32 %v2441_v2, 0.0  ;;  %v2466_v59 = vadd.f32 %v5841_v16, %v5752_v7 }
 0x25e   : > { %v2170_v50 = vadd.f32 %v2169_v33, %v2168_v0  ;;  %v2228_v19 = vsel %vm2145_vm7, %v2200_v45, 0.0  ;;  %v1963_v25 = vmax.f32 %v1941_v37, 0.0  ;;  %v2461_v22 = vadd.f32 %v5849_v41, %v5752_v7 }
 0x25f   : > { %v2226_v58 = vsel %vm2145_vm7, %v2199_v48, 0.0  ;;  %v2202_v23 = vmul.f32 %v1964_v18, %v1964_v18  ;;  %v2175_v63 = vsel %vm2145_vm7, %v1964_v18, 0.0  ;;  %v2678_v7 = vrot.slane %v5867_v55, 4 }
 0x260   : > { %2003 = vrot.lane.b32.xlu1 %v1960_v28, %s5294_s29  ;;  %2001 = vrot.lane.b32.xlu0 %v1959_v31, %s5294_s29  ;;  %v2227_v62 = vadd.f32 %v2226_v58, %v2225_v12  ;;  %v2172_v30 = vadd.f32 %v2171_v26, %v2170_v50  ;;  %v2173_v43 = vsel %vm2145_vm7, %v1963_v25, 0.0  ;;  %v2201_v10 = vmul.f32 %v1963_v25, %v1963_v25 }
 0x261   : > { %v2232_v41 = vsel %vm2145_vm7, %v2202_v23, 0.0  ;;  %v2482_v32 = vmax.f32 %v2456_v11, 0.0  ;;  %v2481_v34 = vmax.f32 %v2451_v15, 0.0  ;;  %v2734_v35 = vrot.slane %v2719_v60, 4 }
 0x262   : > { %v2229_v13 = vadd.f32 %v2228_v19, %v2227_v62  ;;  %v2174_v20 = vadd.f32 %v2173_v43, %v2172_v30  ;;  %v2230_v28 = vsel %vm2145_vm7, %v2201_v10, 0.0  ;;  %v2679_v44 = vadd.f32 %v2678_v7, %v5867_v55  ;;  %v2186_v55 = vld [vmem:[#allocation6] sm:$0x1] }
 0x263   : > { %v2735_v42 = vadd.f32 %v2734_v35, %v2719_v60  ;;  %v2484_v56 = vmax.f32 %v2466_v59, 0.0  ;;  %v2483_v14 = vmax.f32 %v2461_v22, 0.0 }
 0x264   : > { %2523 = vrot.lane.b32.xlu1 %v2480_v17, %s5294_s29  ;;  %2521 = vrot.lane.b32.xlu0 %v2479_v24, %s5294_s29  ;;  %v2176_v27 = vadd.f32 %v2175_v63, %v2174_v20  ;;  %v2231_v16 = vadd.f32 %v2230_v28, %v2229_v13  ;;  %v2680_v54 = vrot.slane %v2679_v44, 2 }
 0x265   : > { %v2736_v1 = vrot.slane %v2735_v42, 2 }
 0x266   : > { %v2177_v38 = vrot.slane %v2176_v27, 4  ;;  %v2233_v31 = vadd.f32 %v2232_v41, %v2231_v16  ;;  %v2681_v60 = vadd.f32 %v2680_v54, %v2679_v44 }
 0x267   : > { %v2737_v0 = vadd.f32 %v2736_v1, %v2735_v42 }
 0x268   : > { %2007 = vrot.lane.b32.xlu1 %v1962_v57, %s5294_s29  ;;  %2005 = vrot.lane.b32.xlu0 %v1961_v29, %s5294_s29  ;;  %v2178_v39 = vadd.f32 %v2177_v38, %v2176_v27  ;;  %v2234_v40 = vrot.slane %v2233_v31, 4  ;;  %v2682_v57 = vrot.slane %v2681_v60, 1 }
 0x269   : > { %v2738_v11 = vrot.slane %v2737_v0, 1 }
 0x26a   : > { %v2179_v46 = vrot.slane %v2178_v39, 2  ;;  %v2235_v47 = vadd.f32 %v2234_v40, %v2233_v31  ;;  %v2683_v29 = vadd.f32 %v2682_v57, %v2681_v60 }
 0x26b   : > { %v2739_v49 = vadd.f32 %v2738_v11, %v2737_v0 }
 0x26c   : > { %2527 = vrot.lane.b32.xlu1 %v2482_v32, %s5294_s29  ;;  %2525 = vrot.lane.b32.xlu0 %v2481_v34, %s5294_s29  ;;  %v2180_v51 = vadd.f32 %v2179_v46, %v2178_v39  ;;  %v2236_v52 = vrot.slane %v2235_v47, 2 }
 0x26e   : > { %v2181_v9 = vrot.slane %v2180_v51, 1  ;;  %v2237_v53 = vadd.f32 %v2236_v52, %v2235_v47 }
 0x270   : > { %2011 = vrot.lane.b32.xlu1 %v1964_v18, %s5294_s29  ;;  %2009 = vrot.lane.b32.xlu0 %v1963_v25, %s5294_s29  ;;  %v2182_v2 = vadd.f32 %v2181_v9, %v2180_v51  ;;  %v2238_v8 = vrot.slane %v2237_v53, 1 }
 0x272   : > { %v2183_v36 = vadd.f32 %v2182_v2, %v2144_v61  ;;  %v2239_v21 = vadd.f32 %v2238_v8, %v2237_v53 }
 0x274   : > { %2531 = vrot.lane.b32.xlu1 %v2484_v56, %s5294_s29  ;;  %2529 = vrot.lane.b32.xlu0 %v2483_v14, %s5294_s29  ;;  %2185 = vst.msk [vmem:[#allocation5] sm:$0x1] %vm2184_vm8, %v2183_v36  ;;  %v2240_v3 = vadd.f32 %v2239_v21, %v2186_v55 }
 0x276   : > { %2241 = vst.msk [vmem:[#allocation6] sm:$0x1] %vm2184_vm8, %v2240_v3 }
 0x27b   : > { %v2646_v12 = vld [vmem:[#allocation5] sm:$0x1] }
 0x27c   : > { %v2684_v45 = vadd.f32 %v2683_v29, %v2646_v12 }
 0x27d   : > { %v2686_v33 = vld [vmem:[#allocation6] sm:$0x1] }
 0x27e   : > { %2685 = vst.msk [vmem:[#allocation5] sm:$0x1] %vm2184_vm8, %v2684_v45  ;;  %v2740_v48 = vadd.f32 %v2739_v49, %v2686_v33 }
 0x280   : > { %2741 = vst.msk [vmem:[#allocation6] sm:$0x1] %vm2184_vm8, %v2740_v48 }
 0x2aa   : > { %v1982_v50 = vpop.permute.xlu0 %1981  ;;  %v2504_v15 = vpop.permute.xlu1 %2503 }
 0x2ab   : > { %2030 = vst.msk [vmem:[#allocation2] sm:$0xff] %vm2029_vm9, %v1982_v50  ;;  %4754 = vst.msk [vmem:[#allocation2 + $0x88] sm:$0xff] %vm2029_vm9, %v2504_v15 }
 0x2ae   : > { %v1984_v17 = vpop.permute.xlu0 %1983  ;;  %v1988_v58 = vpop.permute.xlu1 %1987 }
 0x2af   : > { %2031 = vst.msk [vmem:[#allocation2 + $0x8] sm:$0xff] %vm2029_vm9, %v1984_v17  ;;  %2033 = vst.msk [vmem:[#allocation2 + $0x18] sm:$0xff] %vm2029_vm9, %v1988_v58 }
 0x2b2   : > { %v1986_v26 = vpop.permute.xlu1 %1985  ;;  %v2502_v62 = vpop.permute.xlu0 %2501 }
 0x2b3   : > { %2032 = vst.msk [vmem:[#allocation2 + $0x10] sm:$0xff] %vm2029_vm9, %v1986_v26  ;;  %4753 = vst.msk [vmem:[#allocation2 + $0x80] sm:$0xff] %vm2029_vm9, %v2502_v62 }
 0x2b6   : > { %v2508_v18 = vpop.permute.xlu1 %2507  ;;  %v2506_v37 = vpop.permute.xlu0 %2505 }
 0x2b7   : > { %4756 = vst.msk [vmem:[#allocation2 + $0x98] sm:$0xff] %vm2029_vm9, %v2508_v18  ;;  %4755 = vst.msk [vmem:[#allocation2 + $0x90] sm:$0xff] %vm2029_vm9, %v2506_v37 }
 0x2ba   : > { %v1992_v19 = vpop.permute.xlu1 %1991  ;;  %v1990_v24 = vpop.permute.xlu0 %1989 }
 0x2bb   : > { %2035 = vst.msk [vmem:[#allocation2 + $0x28] sm:$0xff] %vm2029_vm9, %v1992_v19  ;;  %2034 = vst.msk [vmem:[#allocation2 + $0x20] sm:$0xff] %vm2029_vm9, %v1990_v24 }
 0x2be   : > { %v2512_v30 = vpop.permute.xlu1 %2511  ;;  %v2510_v59 = vpop.permute.xlu0 %2509 }
 0x2bf   : > { %4758 = vst.msk [vmem:[#allocation2 + $0xa8] sm:$0xff] %vm2029_vm9, %v2512_v30  ;;  %4757 = vst.msk [vmem:[#allocation2 + $0xa0] sm:$0xff] %vm2029_vm9, %v2510_v59 }
 0x2c2   : > { %v1996_v25 = vpop.permute.xlu1 %1995  ;;  %v1994_v13 = vpop.permute.xlu0 %1993 }
 0x2c3   : > { %2037 = vst.msk [vmem:[#allocation2 + $0x38] sm:$0xff] %vm2029_vm9, %v1996_v25  ;;  %2036 = vst.msk [vmem:[#allocation2 + $0x30] sm:$0xff] %vm2029_vm9, %v1994_v13 }
 0x2c6   : > { %v2516_v22 = vpop.permute.xlu1 %2515  ;;  %v2514_v23 = vpop.permute.xlu0 %2513 }
 0x2c7   : > { %4760 = vst.msk [vmem:[#allocation2 + $0xb8] sm:$0xff] %vm2029_vm9, %v2516_v22  ;;  %4759 = vst.msk [vmem:[#allocation2 + $0xb0] sm:$0xff] %vm2029_vm9, %v2514_v23 }
 0x2ca   : > { %v2000_v43 = vpop.permute.xlu1 %1999  ;;  %v1998_v10 = vpop.permute.xlu0 %1997 }
 0x2cb   : > { %2039 = vst.msk [vmem:[#allocation2 + $0x48] sm:$0xff] %vm2029_vm9, %v2000_v43  ;;  %2038 = vst.msk [vmem:[#allocation2 + $0x40] sm:$0xff] %vm2029_vm9, %v1998_v10 }
 0x2ce   : > { %v2520_v20 = vpop.permute.xlu1 %2519  ;;  %v2518_v63 = vpop.permute.xlu0 %2517 }
 0x2cf   : > { %4762 = vst.msk [vmem:[#allocation2 + $0xc8] sm:$0xff] %vm2029_vm9, %v2520_v20  ;;  %4761 = vst.msk [vmem:[#allocation2 + $0xc0] sm:$0xff] %vm2029_vm9, %v2518_v63 }
 0x2d2   : > { %v2004_v28 = vpop.permute.xlu1 %2003  ;;  %v2002_v27 = vpop.permute.xlu0 %2001 }
 0x2d3   : > { %2041 = vst.msk [vmem:[#allocation2 + $0x58] sm:$0xff] %vm2029_vm9, %v2004_v28  ;;  %2040 = vst.msk [vmem:[#allocation2 + $0x50] sm:$0xff] %vm2029_vm9, %v2002_v27 }
 0x2d6   : > { %v2524_v16 = vpop.permute.xlu1 %2523  ;;  %v2522_v7 = vpop.permute.xlu0 %2521 }
 0x2d7   : > { %4764 = vst.msk [vmem:[#allocation2 + $0xd8] sm:$0xff] %vm2029_vm9, %v2524_v16  ;;  %4763 = vst.msk [vmem:[#allocation2 + $0xd0] sm:$0xff] %vm2029_vm9, %v2522_v7 }
 0x2da   : > { %v2008_v41 = vpop.permute.xlu1 %2007  ;;  %v2006_v32 = vpop.permute.xlu0 %2005 }
 0x2db   : > { %2043 = vst.msk [vmem:[#allocation2 + $0x68] sm:$0xff] %vm2029_vm9, %v2008_v41  ;;  %2042 = vst.msk [vmem:[#allocation2 + $0x60] sm:$0xff] %vm2029_vm9, %v2006_v32 }
 0x2de   : > { %v2528_v34 = vpop.permute.xlu1 %2527  ;;  %v2526_v38 = vpop.permute.xlu0 %2525 }
 0x2df   : > { %4766 = vst.msk [vmem:[#allocation2 + $0xe8] sm:$0xff] %vm2029_vm9, %v2528_v34  ;;  %4765 = vst.msk [vmem:[#allocation2 + $0xe0] sm:$0xff] %vm2029_vm9, %v2526_v38 }
 0x2e2   : > { %v2012_v31 = vpop.permute.xlu1 %2011  ;;  %v2010_v35 = vpop.permute.xlu0 %2009 }
 0x2e3   : > { %2045 = vst.msk [vmem:[#allocation2 + $0x78] sm:$0xff] %vm2029_vm9, %v2012_v31  ;;  %2044 = vst.msk [vmem:[#allocation2 + $0x70] sm:$0xff] %vm2029_vm9, %v2010_v35 }
 0x2e6   : > { %v2532_v39 = vpop.permute.xlu1 %2531  ;;  %v2530_v40 = vpop.permute.xlu0 %2529 }
 0x2e7   : > { %4768 = vst.msk [vmem:[#allocation2 + $0xf8] sm:$0xff] %vm2029_vm9, %v2532_v39  ;;  %4767 = vst.msk [vmem:[#allocation2 + $0xf0] sm:$0xff] %vm2029_vm9, %v2530_v40 }
 0x2e8 PF: > { %p4833_p7 = scmp.ne.s32.totalorder %s5276_s18, 2 }
 0x2e9   : > { %v3599_v44 = vld [vmem:[#allocation5] sm:$0x1] (!%p4833_p7)  ;;  %v3601_v46 = vld [vmem:[#allocation6] sm:$0x1] (!%p4833_p7)  ;;  %v3703_v9 = vlaneseq (!%p4833_p7)  ;;  %s5295_s18 = smov (!%p4833_p7), 16   ;;  %v5296_v55 = vmov (!%p4833_p7), 0.0  }
 0x2ea   : > { %3598 = sbr.rel (%p4833_p7) target bundleno = 1277 (0x4fd), region = 72  ;;  %v3600_v47 = vmul.f32 (!%p4833_p7), 0.005, %v3599_v44  ;;  %v3602_v42 = vmul.f32 (!%p4833_p7), 0.005, %v3601_v46  ;;  %v3610_v8 = vld [vmem:[%s6218_s3] sm:$0xff] (!%p4833_p7)  ;;  %5107 = vmatprep.subr.mxu0 (!%p4833_p7), %v5296_v55 }
 0x2eb   : > { %v5957_v53 = vshrl.u32 (!%p4833_p7), %v3703_v9, 7  ;;  %vm5297_vm10 = vmmov (!%p4833_p7), 0   ;;  %5108 = vmatpush3.msra.mxu0 (!%p4833_p7), %v3610_v8  ;;  %5112 = vmatprep.subr.mxu1 (!%p4833_p7), %v3610_v8  ;;  %vm3611_vm11 = vcmask (!%p4833_p7), 64512   ;;  %v3687_v60 = vld [vmem:[#allocation2] sm:$0xff] (!%p4833_p7)  ;;  %v4852_v57 = vld [vmem:[#allocation2 + $0x88] sm:$0xff] (!%p4833_p7)  ;;  %s5298_s7 = smov (!%p4833_p7), 112  }
 0x2ec   : > { %v3603_v51 = vmul.f32 (!%p4833_p7), %v3600_v47, %v3600_v47  ;;  %5109 = vmatprep.mubr.msk.f32.mxu0 (!%p4833_p7), %vm5297_vm10, %v5296_v55  ;;  %5138 = vmatprep.subr.mxu0 (!%p4833_p7), %v3610_v8  ;;  %v4851_v36 = vld [vmem:[#allocation2 + $0x80] sm:$0xff] (!%p4833_p7)  ;;  %v3688_v11 = vld [vmem:[#allocation2 + $0x8] sm:$0xff] (!%p4833_p7)  ;;  %v4853_v12 = vld [vmem:[#allocation2 + $0x90] sm:$0xff] (!%p4833_p7)  ;;  %vm3956_vm12 = vcmask (!%p4833_p7), 15360  }
 0x2ed   : > { %v3705_v56 = vsub.s32 (!%p4833_p7), 0, %v5957_v53  ;;  %5113 = vmatpush3.msra.mxu1 (!%p4833_p7), %v3610_v8  ;;  %v3689_v49 = vld [vmem:[#allocation2 + $0x10] sm:$0xff] (!%p4833_p7)  ;;  %v4854_v48 = vld [vmem:[#allocation2 + $0x98] sm:$0xff] (!%p4833_p7)  ;;  %v4855_v58 = vld [vmem:[#allocation2 + $0xa0] sm:$0xff] (!%p4833_p7) }
 0x2ee   : > { %v3604_v52 = vsub.f32 (!%p4833_p7), %v3602_v42, %v3603_v51  ;;  %v3690_v50 = vld [vmem:[#allocation2 + $0x18] sm:$0xff] (!%p4833_p7)  ;;  %v3691_v26 = vld [vmem:[#allocation2 + $0x20] sm:$0xff] (!%p4833_p7)  ;;  %v4856_v37 = vld [vmem:[#allocation2 + $0xa8] sm:$0xff] (!%p4833_p7) }
 0x2ef   : > { %v3692_v19 = vld [vmem:[#allocation2 + $0x28] sm:$0xff] (!%p4833_p7)  ;;  %v4857_v59 = vld [vmem:[#allocation2 + $0xb0] sm:$0xff] (!%p4833_p7)  ;;  %v4858_v23 = vld [vmem:[#allocation2 + $0xb8] sm:$0xff] (!%p4833_p7) }
 0x2f0   : > { %v3605_v54 = vadd.f32 (!%p4833_p7), 1e-05, %v3604_v52  ;;  %v3693_v25 = vld [vmem:[#allocation2 + $0x30] sm:$0xff] (!%p4833_p7)  ;;  %v3694_v43 = vld [vmem:[#allocation2 + $0x38] sm:$0xff] (!%p4833_p7)  ;;  %v4859_v63 = vld [vmem:[#allocation2 + $0xc0] sm:$0xff] (!%p4833_p7) }
 0x2f1   : > { %v3695_v28 = vld [vmem:[#allocation2 + $0x40] sm:$0xff]  ;;  %v4860_v7 = vld [vmem:[#allocation2 + $0xc8] sm:$0xff]  ;;  %v4861_v38 = vld [vmem:[#allocation2 + $0xd0] sm:$0xff] }
 0x2f2   : > { %5244 = vrsqrt.f32 %v3605_v54  ;;  %v3696_v41 = vld [vmem:[#allocation2 + $0x48] sm:$0xff]  ;;  %v3697_v31 = vld [vmem:[#allocation2 + $0x50] sm:$0xff]  ;;  %v4862_v40 = vld [vmem:[#allocation2 + $0xd8] sm:$0xff] }
 0x2f3   : > { %v3698_v44 = vld [vmem:[#allocation2 + $0x58] sm:$0xff]  ;;  %v4863_v42 = vld [vmem:[#allocation2 + $0xe0] sm:$0xff]  ;;  %v4864_v9 = vld [vmem:[#allocation2 + $0xe8] sm:$0xff] }
 0x2f4   : > { %v3699_v51 = vld [vmem:[#allocation2 + $0x60] sm:$0xff] }
 0x2fc   : > { %v5245_v14 = vpop.eup %5244 }
 0x2fd   : > { %v3607_v61 = vmul.f32 %v5245_v14, %v5373_v4  ;;  %v3700_v14 = vld [vmem:[#allocation2 + $0x68] sm:$0xff] }
 0x2ff   : > { %v3706_v1 = vrot.slane %v3607_v61, %v3705_v56  ;;  %v3608_v2 = vmul.f32 %v3607_v61, %v3600_v47 }
 0x301   : > { %3708 = vrot.lane.b32.xlu0 %v3706_v1, %s5295_s18  ;;  %v3609_v4 = vsub.f32 %v5378_v5, %v3608_v2  ;;  %v4865_v2 = vld [vmem:[#allocation2 + $0xf0] sm:$0xff] }
 0x303   : > { %5110 = vmatmul.mubr.msk.f32.vlgmr.msra.gmra.mrb[0].mxu0 %vm3611_vm11, %v3609_v4 }
 0x304   : > { %5139 = vmatpush3.msra.mxu0 %v3610_v8  ;;  %v3701_v8 = vld [vmem:[#allocation2 + $0x70] sm:$0xff] }
 0x373   : > { %v5968_v21 = vpop.permute.xlu0 %3708 }
 0x374   : > { %v3711_v0 = vmul.f32 %v5968_v21, %v3687_v60  ;;  %v3991_v3 = vmul.f32 %v4851_v36, %v5968_v21  ;;  %v3992_v5 = vmul.f32 %v4852_v57, %v5968_v21  ;;  %v3712_v29 = vmul.f32 %v5968_v21, %v3688_v11  ;;  %v4866_v60 = vld [vmem:[#allocation2 + $0xf8] sm:$0xff] }
 0x375   : > { %v3993_v45 = vmul.f32 %v4853_v12, %v5968_v21  ;;  %v3713_v33 = vmul.f32 %v5968_v21, %v3689_v49  ;;  %v3994_v15 = vmul.f32 %v4854_v48, %v5968_v21  ;;  %v3714_v17 = vmul.f32 %v5968_v21, %v3690_v50  ;;  %v3702_v36 = vld [vmem:[#allocation2 + $0x78] sm:$0xff] }
 0x376   : > { %3747 = vrot.lane.b32.xlu0 %v3711_v0, %s5298_s7  ;;  %4023 = vrot.lane.b32.xlu1 %v3991_v3, %s5298_s7  ;;  %v3995_v62 = vmul.f32 %v4855_v58, %v5968_v21  ;;  %v3715_v18 = vmul.f32 %v5968_v21, %v3691_v26  ;;  %v3996_v24 = vmul.f32 %v4856_v37, %v5968_v21 }
 0x377   : > { %v3716_v30 = vmul.f32 %v5968_v21, %v3692_v19  ;;  %v3997_v13 = vmul.f32 %v4857_v59, %v5968_v21  ;;  %v3717_v22 = vmul.f32 %v5968_v21, %v3693_v25  ;;  %v3998_v10 = vmul.f32 %v4858_v23, %v5968_v21 }
 0x378   : > { %v3718_v20 = vmul.f32 %v5968_v21, %v3694_v43  ;;  %v3999_v27 = vmul.f32 %v4859_v63, %v5968_v21  ;;  %v3719_v16 = vmul.f32 %v5968_v21, %v3695_v28  ;;  %v4000_v32 = vmul.f32 %v4860_v7, %v5968_v21 }
 0x379   : > { %v3720_v34 = vmul.f32 %v5968_v21, %v3696_v41  ;;  %v4001_v35 = vmul.f32 %v4861_v38, %v5968_v21  ;;  %v3721_v39 = vmul.f32 %v5968_v21, %v3697_v31  ;;  %v4002_v46 = vmul.f32 %v4862_v40, %v5968_v21 }
 0x37a   : > { %4025 = vrot.lane.b32.xlu0 %v3992_v5, %s5298_s7  ;;  %3749 = vrot.lane.b32.xlu1 %v3712_v29, %s5298_s7  ;;  %v3722_v47 = vmul.f32 %v5968_v21, %v3698_v44  ;;  %v4003_v52 = vmul.f32 %v4863_v42, %v5968_v21  ;;  %v3723_v54 = vmul.f32 %v5968_v21, %v3699_v51 }
 0x37b   : > { %v4004_v61 = vmul.f32 %v4864_v9, %v5968_v21  ;;  %v3724_v1 = vmul.f32 %v5968_v21, %v3700_v14  ;;  %v4005_v55 = vmul.f32 %v4865_v2, %v5968_v21  ;;  %v3725_v4 = vmul.f32 %v5968_v21, %v3701_v8 }
 0x37c   : > { %v4006_v0 = vmul.f32 %v4866_v60, %v5968_v21  ;;  %v3726_v3 = vmul.f32 %v5968_v21, %v3702_v36 }
 0x37e   : > { %4027 = vrot.lane.b32.xlu0 %v3993_v45, %s5298_s7  ;;  %3751 = vrot.lane.b32.xlu1 %v3713_v33, %s5298_s7 }
 0x382   : > { %4029 = vrot.lane.b32.xlu0 %v3994_v15, %s5298_s7  ;;  %3753 = vrot.lane.b32.xlu1 %v3714_v17, %s5298_s7 }
 0x386   : > { %4031 = vrot.lane.b32.xlu0 %v3995_v62, %s5298_s7  ;;  %3755 = vrot.lane.b32.xlu1 %v3715_v18, %s5298_s7 }
 0x38a   : > { %4033 = vrot.lane.b32.xlu0 %v3996_v24, %s5298_s7  ;;  %3757 = vrot.lane.b32.xlu1 %v3716_v30, %s5298_s7 }
 0x38e   : > { %4035 = vrot.lane.b32.xlu0 %v3997_v13, %s5298_s7  ;;  %3759 = vrot.lane.b32.xlu1 %v3717_v22, %s5298_s7 }
 0x392   : > { %4037 = vrot.lane.b32.xlu0 %v3998_v10, %s5298_s7  ;;  %3761 = vrot.lane.b32.xlu1 %v3718_v20, %s5298_s7 }
 0x396   : > { %4039 = vrot.lane.b32.xlu0 %v3999_v27, %s5298_s7  ;;  %3763 = vrot.lane.b32.xlu1 %v3719_v16, %s5298_s7 }
 0x39a   : > { %4041 = vrot.lane.b32.xlu0 %v4000_v32, %s5298_s7  ;;  %3765 = vrot.lane.b32.xlu1 %v3720_v34, %s5298_s7 }
 0x39e   : > { %4043 = vrot.lane.b32.xlu0 %v4001_v35, %s5298_s7  ;;  %3767 = vrot.lane.b32.xlu1 %v3721_v39, %s5298_s7 }
 0x3a2   : > { %4045 = vrot.lane.b32.xlu0 %v4002_v46, %s5298_s7  ;;  %3769 = vrot.lane.b32.xlu1 %v3722_v47, %s5298_s7 }
 0x3a6   : > { %4047 = vrot.lane.b32.xlu0 %v4003_v52, %s5298_s7  ;;  %3771 = vrot.lane.b32.xlu1 %v3723_v54, %s5298_s7 }
 0x3aa   : > { %4049 = vrot.lane.b32.xlu0 %v4004_v61, %s5298_s7  ;;  %3773 = vrot.lane.b32.xlu1 %v3724_v1, %s5298_s7 }
 0x3ae   : > { %4051 = vrot.lane.b32.xlu0 %v4005_v55, %s5298_s7  ;;  %3775 = vrot.lane.b32.xlu1 %v3725_v4, %s5298_s7 }
 0x3b2   : > { %4053 = vrot.lane.b32.xlu0 %v4006_v0, %s5298_s7  ;;  %3777 = vrot.lane.b32.xlu1 %v3726_v3, %s5298_s7 }
 0x3d6   : > { %v3681_v16 = vpop.f32.mrb[0].mxu0 }
 0x3d7   : > { %v5111_v7 = vpop.f32.mrb[1].mxu0  ;;  %v3682_v41 = vadd.f32 %v3681_v16, %v5383_v6 }
 0x3d9   : > { %v6069_v32 = vrot.slane %v3682_v41, %v3705_v56 }
 0x3e8   : > { %v3748_v57 = vpop.permute.xlu0 %3747  ;;  %v4024_v11 = vpop.permute.xlu1 %4023 }
 0x3e9   : > { %5114 = vmatprep.mubr.msk.f32.mxu1 %vm3611_vm11, %v3748_v57  ;;  %5140 = vmatprep.mubr.msk.f32.mxu0 %vm3611_vm11, %v4024_v11 }
 0x3ec   : > { %v4026_v5 = vpop.permute.xlu0 %4025  ;;  %v3750_v29 = vpop.permute.xlu1 %3749 }
 0x3ed   : > { %5115 = vmatmul.mubr.msk.f32.vlgmr.msra.gmra.mrb[0].mxu1 %vm3611_vm11, %v3750_v29  ;;  %5141 = vmatmul.mubr.msk.f32.vlgmr.msra.gmra.mrb[2].mxu0 %vm3611_vm11, %v4026_v5 }
 0x3f0   : > { %v4028_v12 = vpop.permute.xlu0 %4027  ;;  %v3752_v49 = vpop.permute.xlu1 %3751 }
 0x3f1   : > { %5117 = vmatprep.mubr.msk.f32.mxu1 %vm3611_vm11, %v3752_v49  ;;  %5143 = vmatprep.mubr.msk.f32.mxu0 %vm3611_vm11, %v4028_v12 }
 0x3f4   : > { %v4030_v21 = vpop.permute.xlu0 %4029  ;;  %v3754_v45 = vpop.permute.xlu1 %3753 }
 0x3f5   : > { %5118 = vmatmul.mubr.msk.f32.gmra.mrb[2].mxu1 %vm3611_vm11, %v3754_v45  ;;  %5144 = vmatmul.mubr.msk.f32.gmra.mrb[4].mxu0 %vm3611_vm11, %v4030_v21 }
 0x3f8   : > { %v4032_v33 = vpop.permute.xlu0 %4031  ;;  %v3756_v48 = vpop.permute.xlu1 %3755 }
 0x3f9   : > { %5120 = vmatprep.mubr.msk.f32.mxu1 %vm3611_vm11, %v3756_v48  ;;  %5146 = vmatprep.mubr.msk.f32.mxu0 %vm3611_vm11, %v4032_v33 }
 0x3fc   : > { %v4034_v50 = vpop.permute.xlu0 %4033  ;;  %v3758_v15 = vpop.permute.xlu1 %3757 }
 0x3fd   : > { %5121 = vmatmul.mubr.msk.f32.gmra.mrb[4].mxu1 %vm3611_vm11, %v3758_v15  ;;  %5147 = vmatmul.mubr.msk.f32.gmra.mrb[6].mxu0 %vm3611_vm11, %v4034_v50 }
 0x400   : > { %v4036_v17 = vpop.permute.xlu0 %4035  ;;  %v3760_v58 = vpop.permute.xlu1 %3759 }
 0x401   : > { %5123 = vmatprep.mubr.msk.f32.mxu1 %vm3611_vm11, %v3760_v58  ;;  %5149 = vmatprep.mubr.msk.f32.mxu0 %vm3611_vm11, %v4036_v17 }
 0x404   : > { %v4038_v26 = vpop.permute.xlu0 %4037  ;;  %v3762_v62 = vpop.permute.xlu1 %3761 }
 0x405   : > { %5124 = vmatmul.mubr.msk.f32.gmra.mrb[6].mxu1 %vm3611_vm11, %v3762_v62  ;;  %5150 = vmatmul.mubr.msk.f32.gmra.mrb[8].mxu0 %vm3611_vm11, %v4038_v26 }
 0x408   : > { %v4040_v18 = vpop.permute.xlu0 %4039  ;;  %v3764_v37 = vpop.permute.xlu1 %3763 }
 0x409   : > { %5126 = vmatprep.mubr.msk.f32.mxu1 %vm3611_vm11, %v3764_v37  ;;  %5152 = vmatprep.mubr.msk.f32.mxu0 %vm3611_vm11, %v4040_v18 }
 0x40c   : > { %v4042_v19 = vpop.permute.xlu0 %4041  ;;  %v3766_v24 = vpop.permute.xlu1 %3765 }
 0x40d   : > { %5127 = vmatmul.mubr.msk.f32.gmra.mrb[8].mxu1 %vm3611_vm11, %v3766_v24  ;;  %5153 = vmatmul.mubr.msk.f32.gmra.mrb[10].mxu0 %vm3611_vm11, %v4042_v19 }
 0x410   : > { %v4044_v30 = vpop.permute.xlu0 %4043  ;;  %v3768_v59 = vpop.permute.xlu1 %3767 }
 0x411   : > { %5129 = vmatprep.mubr.msk.f32.mxu1 %vm3611_vm11, %v3768_v59  ;;  %5155 = vmatprep.mubr.msk.f32.mxu0 %vm3611_vm11, %v4044_v30 }
 0x414   : > { %v4046_v25 = vpop.permute.xlu0 %4045  ;;  %v3770_v13 = vpop.permute.xlu1 %3769 }
 0x415   : > { %5130 = vmatmul.mubr.msk.f32.gmra.mrb[10].mxu1 %vm3611_vm11, %v3770_v13  ;;  %5156 = vmatmul.mubr.msk.f32.gmra.mrb[12].mxu0 %vm3611_vm11, %v4046_v25 }
 0x418   : > { %v4048_v22 = vpop.permute.xlu0 %4047  ;;  %v3772_v23 = vpop.permute.xlu1 %3771 }
 0x419   : > { %5132 = vmatprep.mubr.msk.f32.mxu1 %vm3611_vm11, %v3772_v23  ;;  %5158 = vmatprep.mubr.msk.f32.mxu0 %vm3611_vm11, %v4048_v22 }
 0x41c   : > { %v4050_v43 = vpop.permute.xlu0 %4049  ;;  %v3774_v10 = vpop.permute.xlu1 %3773 }
 0x41d   : > { %5133 = vmatmul.mubr.msk.f32.gmra.mrb[12].mxu1 %vm3611_vm11, %v3774_v10  ;;  %5159 = vmatmul.mubr.msk.f32.gmra.mrb[14].mxu0 %vm3611_vm11, %v4050_v43 }
 0x420   : > { %v4052_v20 = vpop.permute.xlu0 %4051  ;;  %v3776_v63 = vpop.permute.xlu1 %3775 }
 0x421   : > { %5135 = vmatprep.mubr.msk.f32.mxu1 %vm3611_vm11, %v3776_v63  ;;  %5161 = vmatprep.mubr.msk.f32.mxu0 %vm3611_vm11, %v4052_v20 }
 0x424   : > { %v4054_v28 = vpop.permute.xlu0 %4053  ;;  %v3778_v27 = vpop.permute.xlu1 %3777 }
 0x425   : > { %5136 = vmatmul.mubr.msk.f32.gmra.mrb[14].mxu1 %vm3611_vm11, %v3778_v27  ;;  %5162 = vmatmul.mubr.msk.f32.gmra.mrb[16].mxu0 %vm3611_vm11, %v4054_v28 }
 0x4c0   : > { %v5116_v34 = vpop.f32.mrb[0].mxu1  ;;  %v5142_v38 = vpop.f32.mrb[2].mxu0 }
 0x4c1   : > { %v3883_v31 = vadd.f32 %v5116_v34, %v6069_v32  ;;  %v4159_v35 = vadd.f32 %v5142_v38, %v6069_v32  ;;  %v3877_v39 = vpop.f32.mrb[1].mxu1  ;;  %v4153_v40 = vpop.f32.mrb[3].mxu0 }
 0x4c2   : > { %v3878_v44 = vadd.f32 %v3877_v39, %v6069_v32  ;;  %v4154_v46 = vadd.f32 %v4153_v40, %v6069_v32 }
 0x4c3   : > { %3958 = vst.msk [vmem:[#allocation7 + $0x8] sm:$0xff] %vm3956_vm12, %v3883_v31  ;;  %4884 = vst.msk [vmem:[#allocation7 + $0x88] sm:$0xff] %vm3956_vm12, %v4159_v35 }
 0x4c4   : > { %3957 = vst.msk [vmem:[#allocation7] sm:$0xff] %vm3956_vm12, %v3878_v44  ;;  %4883 = vst.msk [vmem:[#allocation7 + $0x80] sm:$0xff] %vm3956_vm12, %v4154_v46 }
 0x4c8   : > { %v5119_v6 = vpop.f32.mrb[2].mxu1  ;;  %v5145_v53 = vpop.f32.mrb[4].mxu0 }
 0x4c9   : > { %v3893_v56 = vadd.f32 %v5119_v6, %v6069_v32  ;;  %v4169_v47 = vadd.f32 %v5145_v53, %v6069_v32  ;;  %v3887_v42 = vpop.f32.mrb[3].mxu1  ;;  %v4163_v51 = vpop.f32.mrb[5].mxu0 }
 0x4ca   : > { %v3888_v52 = vadd.f32 %v3887_v42, %v6069_v32  ;;  %v4164_v54 = vadd.f32 %v4163_v51, %v6069_v32 }
 0x4cb   : > { %3960 = vst.msk [vmem:[#allocation7 + $0x18] sm:$0xff] %vm3956_vm12, %v3893_v56  ;;  %4886 = vst.msk [vmem:[#allocation7 + $0x98] sm:$0xff] %vm3956_vm12, %v4169_v47 }
 0x4cc   : > { %3959 = vst.msk [vmem:[#allocation7 + $0x10] sm:$0xff] %vm3956_vm12, %v3888_v52  ;;  %4885 = vst.msk [vmem:[#allocation7 + $0x90] sm:$0xff] %vm3956_vm12, %v4164_v54 }
 0x4d0   : > { %v5122_v9 = vpop.f32.mrb[4].mxu1  ;;  %v5148_v14 = vpop.f32.mrb[6].mxu0 }
 0x4d1   : > { %v3903_v61 = vadd.f32 %v5122_v9, %v6069_v32  ;;  %v4179_v1 = vadd.f32 %v5148_v14, %v6069_v32  ;;  %v3897_v2 = vpop.f32.mrb[5].mxu1  ;;  %v4173_v8 = vpop.f32.mrb[7].mxu0 }
 0x4d2   : > { %v3898_v55 = vadd.f32 %v3897_v2, %v6069_v32  ;;  %v4174_v4 = vadd.f32 %v4173_v8, %v6069_v32 }
 0x4d3   : > { %3962 = vst.msk [vmem:[#allocation7 + $0x28] sm:$0xff] %vm3956_vm12, %v3903_v61  ;;  %4888 = vst.msk [vmem:[#allocation7 + $0xa8] sm:$0xff] %vm3956_vm12, %v4179_v1 }
 0x4d4   : > { %3961 = vst.msk [vmem:[#allocation7 + $0x20] sm:$0xff] %vm3956_vm12, %v3898_v55  ;;  %4887 = vst.msk [vmem:[#allocation7 + $0xa0] sm:$0xff] %vm3956_vm12, %v4174_v4 }
 0x4d8   : > { %v5125_v60 = vpop.f32.mrb[6].mxu1  ;;  %v5151_v36 = vpop.f32.mrb[8].mxu0 }
 0x4d9   : > { %v3913_v0 = vadd.f32 %v5125_v60, %v6069_v32  ;;  %v4189_v3 = vadd.f32 %v5151_v36, %v6069_v32  ;;  %v3907_v57 = vpop.f32.mrb[7].mxu1  ;;  %v4183_v11 = vpop.f32.mrb[9].mxu0 }
 0x4da   : > { %v3908_v5 = vadd.f32 %v3907_v57, %v6069_v32  ;;  %v4184_v29 = vadd.f32 %v4183_v11, %v6069_v32 }
 0x4db   : > { %3964 = vst.msk [vmem:[#allocation7 + $0x38] sm:$0xff] %vm3956_vm12, %v3913_v0  ;;  %4890 = vst.msk [vmem:[#allocation7 + $0xb8] sm:$0xff] %vm3956_vm12, %v4189_v3 }
 0x4dc   : > { %3963 = vst.msk [vmem:[#allocation7 + $0x30] sm:$0xff] %vm3956_vm12, %v3908_v5  ;;  %4889 = vst.msk [vmem:[#allocation7 + $0xb0] sm:$0xff] %vm3956_vm12, %v4184_v29 }
 0x4e0   : > { %v5128_v12 = vpop.f32.mrb[8].mxu1  ;;  %v5154_v49 = vpop.f32.mrb[10].mxu0 }
 0x4e1   : > { %v3923_v21 = vadd.f32 %v5128_v12, %v6069_v32  ;;  %v3917_v45 = vpop.f32.mrb[9].mxu1  ;;  %v4193_v33 = vpop.f32.mrb[11].mxu0 }
 0x4e2   : > { %v3918_v48 = vadd.f32 %v3917_v45, %v6069_v32  ;;  %v4194_v50 = vadd.f32 %v4193_v33, %v6069_v32 }
 0x4e3   : > { %3966 = vst.msk [vmem:[#allocation7 + $0x48] sm:$0xff] %vm3956_vm12, %v3923_v21 }
 0x4e4   : > { %3965 = vst.msk [vmem:[#allocation7 + $0x40] sm:$0xff] %vm3956_vm12, %v3918_v48  ;;  %4891 = vst.msk [vmem:[#allocation7 + $0xc0] sm:$0xff] %vm3956_vm12, %v4194_v50 }
 0x4e8   : > { %v5131_v15 = vpop.f32.mrb[10].mxu1  ;;  %v5157_v17 = vpop.f32.mrb[12].mxu0 }
 0x4e9   : > { %v3933_v58 = vadd.f32 %v5131_v15, %v6069_v32  ;;  %v3927_v26 = vpop.f32.mrb[11].mxu1  ;;  %v4203_v62 = vpop.f32.mrb[13].mxu0 }
 0x4ea   : > { %v3928_v18 = vadd.f32 %v3927_v26, %v6069_v32 }
 0x4eb   : > { %3968 = vst.msk [vmem:[#allocation7 + $0x58] sm:$0xff] %vm3956_vm12, %v3933_v58 }
 0x4ec   : > { %3967 = vst.msk [vmem:[#allocation7 + $0x50] sm:$0xff] %vm3956_vm12, %v3928_v18 }
 0x4f0   : > { %v5134_v37 = vpop.f32.mrb[12].mxu1  ;;  %v5160_v19 = vpop.f32.mrb[14].mxu0 }
 0x4f1   : > { %v3943_v24 = vadd.f32 %v5134_v37, %v6069_v32  ;;  %v3937_v30 = vpop.f32.mrb[13].mxu1  ;;  %v4213_v59 = vpop.f32.mrb[15].mxu0 }
 0x4f2   : > { %v3938_v25 = vadd.f32 %v3937_v30, %v6069_v32 }
 0x4f3   : > { %3970 = vst.msk [vmem:[#allocation7 + $0x68] sm:$0xff] %vm3956_vm12, %v3943_v24 }
 0x4f4   : > { %3969 = vst.msk [vmem:[#allocation7 + $0x60] sm:$0xff] %vm3956_vm12, %v3938_v25 }
 0x4f8   : > { %v5137_v13 = vpop.f32.mrb[14].mxu1  ;;  %v5163_v22 = vpop.f32.mrb[16].mxu0 }
 0x4f9   : > { %v3953_v23 = vadd.f32 %v5137_v13, %v6069_v32  ;;  %v3947_v43 = vpop.f32.mrb[15].mxu1  ;;  %v4223_v10 = vpop.f32.mrb[17].mxu0 }
 0x4fa   : > { %v3948_v20 = vadd.f32 %v3947_v43, %v6069_v32 }
 0x4fb   : > { %3972 = vst.msk [vmem:[#allocation7 + $0x78] sm:$0xff] %vm3956_vm12, %v3953_v23 }
 0x4fc   : > { %3971 = vst.msk [vmem:[#allocation7 + $0x70] sm:$0xff] %vm3956_vm12, %v3948_v20 }
 0x4fd PF: > { %p4899_p8 = scmp.ne.s32.totalorder %s4595_s21, 2 }
 0x4fe   : > { %s6123_s8 = smov (!%p4899_p8), 0  }
 0x4ff   : > { %4255 = sbr.rel (%p4899_p8) target bundleno = 1300 (0x514), region = 76 }
 0x506 LB: >> { %v4378_v63 = vld [vmem:[#allocation7] sm:$0xff]  ;;  %v4380_v28 = vld [vmem:[#allocation7 + $0x8] sm:$0xff]  ;;  %v4382_v27 = vld [vmem:[#allocation7 + $0x10] sm:$0xff]  ;;  %s4372_s8 = sadd.s32 1, %s5288_s8   ;;  %s5288_s8 = sphi %s6123_s8, %s4372_s8  }
 0x507   : >> { %4379 = vst [vmem:[%s6220_s5] sm:$0xff] %v4378_v63  ;;  %4381 = vst [vmem:[%s6220_s5 + $0x8] sm:$0xff] %v4380_v28  ;;  %v4384_v16 = vld [vmem:[#allocation7 + $0x18] sm:$0xff]  ;;  %v4386_v7 = vld [vmem:[#allocation7 + $0x20] sm:$0xff]  ;;  %p4371_p9 = scmp.ge.s32.totalorder %s4372_s8, 1 }
 0x508   : >> { %4383 = vst [vmem:[%s6220_s5 + $0x10] sm:$0xff] %v4382_v27  ;;  %v4388_v41 = vld [vmem:[#allocation7 + $0x28] sm:$0xff]  ;;  %4385 = vst [vmem:[%s6220_s5 + $0x18] sm:$0xff] %v4384_v16  ;;  %v4390_v32 = vld [vmem:[#allocation7 + $0x30] sm:$0xff] }
 0x509   : >> { %4387 = vst [vmem:[%s6220_s5 + $0x20] sm:$0xff] %v4386_v7  ;;  %4389 = vst [vmem:[%s6220_s5 + $0x28] sm:$0xff] %v4388_v41  ;;  %v4392_v34 = vld [vmem:[#allocation7 + $0x38] sm:$0xff]  ;;  %v4394_v38 = vld [vmem:[#allocation7 + $0x40] sm:$0xff] }
 0x50a   : >> { %4391 = vst [vmem:[%s6220_s5 + $0x30] sm:$0xff] %v4390_v32  ;;  %4393 = vst [vmem:[%s6220_s5 + $0x38] sm:$0xff] %v4392_v34  ;;  %v4396_v31 = vld [vmem:[#allocation7 + $0x48] sm:$0xff]  ;;  %v4398_v35 = vld [vmem:[#allocation7 + $0x50] sm:$0xff] }
 0x50b   : >> { %4395 = vst [vmem:[%s6220_s5 + $0x40] sm:$0xff] %v4394_v38  ;;  %v4400_v39 = vld [vmem:[#allocation7 + $0x58] sm:$0xff]  ;;  %4397 = vst [vmem:[%s6220_s5 + $0x48] sm:$0xff] %v4396_v31  ;;  %v4402_v40 = vld [vmem:[#allocation7 + $0x60] sm:$0xff] }
 0x50c   : >> { %4399 = vst [vmem:[%s6220_s5 + $0x50] sm:$0xff] %v4398_v35  ;;  %4401 = vst [vmem:[%s6220_s5 + $0x58] sm:$0xff] %v4400_v39  ;;  %v4404_v44 = vld [vmem:[#allocation7 + $0x68] sm:$0xff]  ;;  %v4406_v46 = vld [vmem:[#allocation7 + $0x70] sm:$0xff] }
 0x50d   : >> { %4403 = vst [vmem:[%s6220_s5 + $0x60] sm:$0xff] %v4402_v40  ;;  %4405 = vst [vmem:[%s6220_s5 + $0x68] sm:$0xff] %v4404_v44  ;;  %v4408_v6 = vld [vmem:[#allocation7 + $0x78] sm:$0xff]  ;;  %v4410_v53 = vld [vmem:[#allocation7 + $0x80] sm:$0xff]  ;;  %4374 = sbr.rel (!%p4371_p9) target bundleno = 1286 (0x506), region = 175 }
 0x50e   : >> { %4407 = vst [vmem:[%s6220_s5 + $0x70] sm:$0xff] %v4406_v46  ;;  %v4412_v56 = vld [vmem:[#allocation7 + $0x88] sm:$0xff]  ;;  %4409 = vst [vmem:[%s6220_s5 + $0x78] sm:$0xff] %v4408_v6  ;;  %v4414_v47 = vld [vmem:[#allocation7 + $0x90] sm:$0xff] }
 0x50f   : >> { %4411 = vst [vmem:[%s6220_s5 + $0x80] sm:$0xff] %v4410_v53  ;;  %4413 = vst [vmem:[%s6220_s5 + $0x88] sm:$0xff] %v4412_v56  ;;  %v4416_v42 = vld [vmem:[#allocation7 + $0x98] sm:$0xff]  ;;  %v4418_v51 = vld [vmem:[#allocation7 + $0xa0] sm:$0xff] }
 0x510   : >> { %4415 = vst [vmem:[%s6220_s5 + $0x90] sm:$0xff] %v4414_v47  ;;  %4417 = vst [vmem:[%s6220_s5 + $0x98] sm:$0xff] %v4416_v42  ;;  %v4420_v52 = vld [vmem:[#allocation7 + $0xa8] sm:$0xff]  ;;  %v4422_v54 = vld [vmem:[#allocation7 + $0xb0] sm:$0xff] }
 0x511   : >> { %4419 = vst [vmem:[%s6220_s5 + $0xa0] sm:$0xff] %v4418_v51  ;;  %v4424_v9 = vld [vmem:[#allocation7 + $0xb8] sm:$0xff]  ;;  %4421 = vst [vmem:[%s6220_s5 + $0xa8] sm:$0xff] %v4420_v52  ;;  %v4426_v14 = vld [vmem:[#allocation7 + $0xc0] sm:$0xff] }
 0x512   : >> { %4423 = vst [vmem:[%s6220_s5 + $0xb0] sm:$0xff] %v4422_v54  ;;  %4425 = vst [vmem:[%s6220_s5 + $0xb8] sm:$0xff] %v4424_v9 }
 0x513   : >> { %4427 = vst [vmem:[%s6220_s5 + $0xc0] sm:$0xff] %v4426_v14 }
 0x514 PF: > { %s15_s20 = sadd.s32 1, %s5284_s20   ;;  %s6221_s18 = smov %s5280_s19 }
 0x515   : > { %p12_p10 = scmp.ge.s32.totalorder %s15_s20, 5   ;;  %s6222_s19 = smov %s6224_s22 }
 0x517   :  { %14 = sbr.rel (!%p12_p10) target bundleno = 2 (0x2), region = 197 }

</bundles_post_ra>
